<compile_context>
chip_gen: v6e
topology: v6e:2x2x1
jax: 0.10.0
libtpu: 0.0.40
codegen_flags: <defaults>
</compile_context>

<pallas_src>
import functools

import numpy as np
import jax
import jax.numpy as jnp
from jax.experimental import pallas as pl
from jax.experimental.pallas import tpu as pltpu


def _gridsample_kernel(kstart_ref, nblk_ref, proj_ref, coords_ref, feat_ref,
                       out_ref, acc_ref, *, Hf, Wf, Himg, Wimg, block_k, ntiles):
    """grid = (image j, query tile i, K block kk over flattened Hf*Wf feature pixels).

    kstart_ref : SMEM (n_img*ntiles,) i32 -- first in-band K block per (image, tile)
    nblk_ref   : SMEM (n_img*ntiles,) i32 -- in-band K block count per (image, tile)
    proj_ref   : SMEM (n_img*12,)     f32 -- (P @ [[R,T],[0,0,0,1]]).T row-major per image
    coords_ref : VMEM (3, TQ)   f32       -- pseudo-lidar (x, y, z), queries on lanes
    feat_ref   : VMEM (1, NC, BK) bf16    -- feature K block (clamped to the band)
    out_ref    : VMEM (1, NC, TQ) f32
    acc_ref    : VMEM (NC, TQ)  f32       -- scratch accumulator
    """
    j = pl.program_id(0)
    i = pl.program_id(1)
    kk = pl.program_id(2)

    @pl.when(kk == 0)
    def _():
        acc_ref[...] = jnp.zeros_like(acc_ref)

    idx = j * ntiles + i
    in_band = kk < nblk_ref[idx]

    @pl.when(in_band)
    def _():
        # ---- project this tile of voxel centers to feature-map pixel coordinates ----
        off = j * 12
        c = coords_ref[...]                        # (3, TQ)
        px = -c[1:2, :]                            # rect-cam X = -y
        py = -c[2:3, :]                            # rect-cam Y = -z
        pz = c[0:1, :]                             # rect-cam Z =  x

        def pcol(ci):                              # [(px,py,pz),1] @ proj[:, ci]
            return (px * proj_ref[off + ci] + py * proj_ref[off + 3 + ci]
                    + pz * proj_ref[off + 6 + ci] + proj_ref[off + 9 + ci])

        z = pcol(2)
        inv_z = 1.0 / z             # exact: approx reciprocal would move sample coords
        u = pcol(0) * inv_z
        v = pcol(1) * inv_z
        u = jnp.where(jnp.abs(u) > 10000.0, -1.0, u)
        v = jnp.where(jnp.abs(v) > 10000.0, -1.0, v)

        # normalize to [-1,1] over the full-image crop, unnormalize to feature pixels
        # (align_corners=True; depth grid coord is zeroed => the D=1 slice has weight 1).
        gx = u / (Wimg - 1.0) * 2.0 - 1.0
        gy = v / (Himg - 1.0) * 2.0 - 1.0
        ix = (gx + 1.0) * 0.5 * (Wf - 1.0)         # (1, TQ)
        iy = (gy + 1.0) * 0.5 * (Hf - 1.0)

        # ---- bilinear hat weights for this K block, (BK, TQ) lane-dense ----
        hw0 = ((kstart_ref[idx] + kk) * block_k).astype(jnp.float32)
        hw = jax.lax.broadcasted_iota(jnp.int32, (block_k, 1), 0).astype(jnp.float32) + hw0
        rowp = jnp.floor((hw + 0.5) * (1.0 / Wf))  # hw // Wf (robust in f32), (BK, 1)
        colp = hw - rowp * Wf                      # hw %  Wf,                 (BK, 1)
        wgt = (jnp.maximum(0.0, 1.0 - jnp.abs(ix - colp))
               * jnp.maximum(0.0, 1.0 - jnp.abs(iy - rowp)))   # (BK, TQ); zeros padding

        # single bf16 MXU pass, f32 accumulation
        acc_ref[...] += jnp.dot(feat_ref[0], wgt.astype(jnp.bfloat16),
                                preferred_element_type=jnp.float32)

    @pl.when(kk == pl.num_programs(2) - 1)
    def _():
        out_ref[0] = acc_ref[...]


def _pick_block_k(HW, cap=2048):
    """Largest multiple-of-128 divisor of HW that is <= cap; fall back to full HW."""
    if HW % 128 == 0:
        bk = min(cap, HW)
        bk -= bk % 128
        while bk > 0 and HW % bk != 0:
            bk -= 128
        if bk > 0:
            return bk
    return HW


def _row_band(proj_flat, coords, *, Hf, Wf, Himg, tq, block_k, nkb):
    """Per query tile: K-block range [k_lo, k_lo+nblk) covering every feature row that
    can receive nonzero bilinear weight (padded by one row each side for safety)."""
    p = proj_flat
    px = -coords[1]
    py = -coords[2]
    pz = coords[0]
    z = px * p[2] + py * p[5] + pz * p[8] + p[11]
    v = (px * p[1] + py * p[4] + pz * p[7] + p[10]) / z
    v = jnp.where(jnp.abs(v) > 10000.0, -1.0, v)
    iy = ((v / (Himg - 1.0) * 2.0 - 1.0) + 1.0) * 0.5 * (Hf - 1.0)
    iy = jnp.nan_to_num(iy, nan=0.0, posinf=float(Hf), neginf=-1.0)
    iy = jnp.clip(iy, -1.0, float(Hf))
    iy_t = iy.reshape(-1, tq)
    r_lo = jnp.floor(iy_t.min(axis=1)).astype(jnp.int32) - 1
    r_hi = jnp.floor(iy_t.max(axis=1)).astype(jnp.int32) + 2
    r_lo = jnp.clip(r_lo, 0, Hf - 1)
    r_hi = jnp.clip(r_hi, 0, Hf - 1)
    k_lo = (r_lo * Wf) // block_k
    k_hi = ((r_hi + 1) * Wf + block_k - 1) // block_k          # exclusive, in blocks
    k_lo = jnp.clip(k_lo, 0, nkb - 1)
    k_hi = jnp.clip(k_hi, k_lo + 1, nkb)
    return k_lo.astype(jnp.int32), (k_hi - k_lo).astype(jnp.int32)


def _sample_images(kstart, nblk, proj_all, coords, feat_all, *,
                   Hf, Wf, Himg, Wimg, tq, block_k, ntiles):
    n_img, NC, HW = feat_all.shape
    _, Mp = coords.shape
    assert Mp == ntiles * tq and HW % block_k == 0
    nkb = HW // block_k
    kernel = functools.partial(_gridsample_kernel, Hf=Hf, Wf=Wf, Himg=Himg, Wimg=Wimg,
                               block_k=block_k, ntiles=ntiles)
    grid_spec = pltpu.PrefetchScalarGridSpec(
        num_scalar_prefetch=2,
        grid=(n_img, ntiles, nkb),
        in_specs=[
            pl.BlockSpec(memory_space=pltpu.MemorySpace.SMEM),          # proj (n_img*12,)
            pl.BlockSpec((3, tq), lambda j, i, kk, ks, nb: (0, i)),     # coords (3, Mp)
            pl.BlockSpec(                                               # features bf16
                (1, NC, block_k),
                lambda j, i, kk, ks, nb: (
                    j, 0,
                    ks[j * ntiles + i] + jnp.minimum(kk, nb[j * ntiles + i] - 1))),
        ],
        out_specs=pl.BlockSpec((1, NC, tq), lambda j, i, kk, ks, nb: (j, 0, i)),
        scratch_shapes=[pltpu.VMEM((NC, tq), jnp.float32)],
    )
    return pl.pallas_call(
        kernel,
        out_shape=jax.ShapeDtypeStruct((n_img, NC, Mp), jnp.float32),
        grid_spec=grid_spec,
        compiler_params=pltpu.CompilerParams(
            dimension_semantics=("parallel", "parallel", "arbitrary"),
            vmem_limit_bytes=64 * 1024 * 1024,
        ),
    )(kstart, nblk, proj_all, coords, feat_all)


def gridsample_forward(coords_3d, stereo_feat, Ps, Rs, Ts, image_hw, *, tq=256, block_k=None):
    """Equivalent of GridSampleSimple.forward -> batch_dict['voxel_feature'].

    coords_3d:   (GZ, GY, GX, 3) float32 pseudo-lidar grid centers (x, y, z)
    stereo_feat: (N, n_img, C, Hf, Wf) float32  (torch NCHW per image)
    Ps:          (n_img, 3, 4), Rs: (n_img, 3, 3), Ts: (n_img, 3)
    image_hw:    (Himg, Wimg) — batch_dict['image_X'].shape[2:], used for normalization
    returns      (N, n_img, C, GZ, GY, GX) float32
    """
    GZ, GY, GX, _ = coords_3d.shape
    N, n_img, C, Hf, Wf = stereo_feat.shape
    Himg, Wimg = image_hw
    M = GZ * GY * GX
    HW = Hf * Wf
    NC = N * C
    if block_k is None:
        block_k = _pick_block_k(HW)
    nkb = HW // block_k

    # queries on lanes: (3, M), edge-replicated pad to a multiple of tq
    coords = coords_3d.reshape(M, 3).astype(jnp.float32).T
    Mp = ((M + tq - 1) // tq) * tq
    if Mp != M:
        coords = jnp.concatenate(
            [coords, jnp.broadcast_to(coords[:, -1:], (3, Mp - M))], axis=1)
    ntiles = Mp // tq

    # per image: fold calib into a 12-scalar projection + per-tile feature-row K band
    proj_list, ks_list, nb_list = [], [], []
    for j in range(n_img):
        RT44 = jnp.concatenate(
            [jnp.concatenate([Rs[j], Ts[j][:, None]], axis=1),
             jnp.array([[0.0, 0.0, 0.0, 1.0]], jnp.float32)], axis=0)        # (4, 4)
        proj_flat = (Ps[j] @ RT44).T.astype(jnp.float32).reshape(12)         # (4,3) row-major
        ks, nb = _row_band(proj_flat, coords, Hf=Hf, Wf=Wf, Himg=Himg,
                           tq=tq, block_k=block_k, nkb=nkb)
        proj_list.append(proj_flat)
        ks_list.append(ks)
        nb_list.append(nb)
    proj_all = jnp.concatenate(proj_list).astype(jnp.float32)                # (n_img*12,)
    kstart = jnp.concatenate(ks_list).astype(jnp.int32)                      # (n_img*ntiles,)
    nblk = jnp.concatenate(nb_list).astype(jnp.int32)

    feat_all = (jnp.transpose(stereo_feat, (1, 0, 2, 3, 4))
                .reshape(n_img, NC, HW).astype(jnp.bfloat16))                # (n_img, N*C, HW)

    out = _sample_images(kstart, nblk, proj_all, coords, feat_all,
                         Hf=Hf, Wf=Wf, Himg=Himg, Wimg=Wimg,
                         tq=tq, block_k=block_k, ntiles=ntiles)              # (n_img, NC, Mp)
    out = out[:, :, :M].reshape(n_img, N, C, GZ, GY, GX)
    return jnp.transpose(out, (1, 0, 2, 3, 4, 5))                            # (N, n_img, C, ...)


def make_coordinates_3d(pc_range, voxel_size, grid_size):
    X_MIN, Y_MIN, Z_MIN, X_MAX, Y_MAX, Z_MAX = pc_range
    vx, vy, vz = voxel_size
    GX, GY, GZ = grid_size
    zs = jnp.linspace(Z_MIN + vz / 2.0, Z_MAX - vz / 2.0, GZ, dtype=jnp.float32)
    ys = jnp.linspace(Y_MIN + vy / 2.0, Y_MAX - vy / 2.0, GY, dtype=jnp.float32)
    xs = jnp.linspace(X_MIN + vx / 2.0, X_MAX - vx / 2.0, GX, dtype=jnp.float32)
    zg, yg, xg = jnp.meshgrid(zs, ys, xs, indexing="ij")
    return jnp.stack([xg, yg, zg], axis=-1)                                  # (GZ, GY, GX, 3)


def _bf16_np(x):
    return np.asarray(jnp.asarray(np.asarray(x, np.float32), jnp.bfloat16).astype(jnp.float32))


def _numpy_reference(coords, stereo_feat, Ps, Rs, Ts, Himg, Wimg):
    coords = np.asarray(coords, np.float32)
    stereo_feat = np.asarray(stereo_feat, np.float32)
    Ps, Rs, Ts = (np.asarray(a, np.float32) for a in (Ps, Rs, Ts))
    GZ, GY, GX, _ = coords.shape
    N, n_img, C, Hf, Wf = stereo_feat.shape
    M = GZ * GY * GX
    c3d = coords.reshape(M, 3)
    plc = np.stack([-c3d[:, 1], -c3d[:, 2], c3d[:, 0]], axis=-1)
    hom = np.concatenate([plc, np.ones((M, 1), np.float32)], axis=1)
    per_img = []
    for j in range(n_img):
        RT = np.concatenate([np.concatenate([Rs[j], Ts[j][:, None]], axis=1),
                             np.array([[0, 0, 0, 1]], np.float32)], axis=0)
        proj = (Ps[j] @ RT).T
        img = hom @ proj
        u = img[:, 0] / img[:, 2]
        v = img[:, 1] / img[:, 2]
        u = np.where(np.abs(u) > 10000.0, -1.0, u).astype(np.float32)
        v = np.where(np.abs(v) > 10000.0, -1.0, v).astype(np.float32)
        gx = u / (Wimg - 1.0) * 2.0 - 1.0
        gy = v / (Himg - 1.0) * 2.0 - 1.0
        ix = (gx + 1.0) * 0.5 * (Wf - 1.0)
        iy = (gy + 1.0) * 0.5 * (Hf - 1.0)
        x0 = np.floor(ix).astype(np.int64); x1 = x0 + 1
        y0 = np.floor(iy).astype(np.int64); y1 = y0 + 1
        wx1 = ix - x0; wx0 = 1.0 - wx1
        wy1 = iy - y0; wy0 = 1.0 - wy1
        # mirror the kernel's bf16 weight quantization (f32 hat product cast to bf16)
        w00 = _bf16_np(wy0 * wx0); w01 = _bf16_np(wy0 * wx1)
        w10 = _bf16_np(wy1 * wx0); w11 = _bf16_np(wy1 * wx1)
        per_b = []
        for n in range(N):
            feat = stereo_feat[n, j]

            def corner(yy, xx):
                valid = (xx >= 0) & (xx < Wf) & (yy >= 0) & (yy < Hf)
                xc = np.clip(xx, 0, Wf - 1)
                yc = np.clip(yy, 0, Hf - 1)
                vals = feat[:, yc, xc]
                return np.where(valid[None, :], vals, 0.0)

            samp = (corner(y0, x0) * w00[None] + corner(y0, x1) * w01[None]
                    + corner(y1, x0) * w10[None] + corner(y1, x1) * w11[None])
            per_b.append(samp.reshape(C, GZ, GY, GX))
        per_img.append(np.stack(per_b, 0))
    return np.stack(per_img, 1)


if __name__ == "__main__":
    key = jax.random.PRNGKey(0)

    # small, shape-consistent config (reference uses grid (20, 304, 388); scaled down here)
    N, n_img, C = 2, 2, 8
    Hf = Wf = 32            # stereo feature map spatial dims -> HW = 1024
    Himg = Wimg = 32        # image (crop) dims
    GX, GY, GZ = 16, 8, 4   # voxel grid -> M = 512 query points (2 tiles of 256)

    pc_range = [2.0, -3.0, -1.0, 6.0, 3.0, 1.0]
    voxel_size = [(pc_range[3] - pc_range[0]) / GX,
                  (pc_range[4] - pc_range[1]) / GY,
                  (pc_range[5] - pc_range[2]) / GZ]
    coords_3d = make_coordinates_3d(pc_range, voxel_size, (GX, GY, GZ))

    stereo_feat = jax.random.normal(key, (N, n_img, C, Hf, Wf), dtype=jnp.float32)

    # deterministic synthetic calibration (KITTI-style stereo pair: image_2 / image_3)
    fx = fy = 12.0
    cx = cy = (Wimg - 1) / 2.0
    P2 = jnp.array([[fx, 0.0, cx, 0.0], [0.0, fy, cy, 0.0], [0.0, 0.0, 1.0, 0.0]], jnp.float32)
    P3 = jnp.array([[fx, 0.0, cx, -4.0], [0.0, fy, cy, 0.0], [0.0, 0.0, 1.0, 0.0]], jnp.float32)
    Ps = jnp.stack([P2, P3])
    Rs = jnp.stack([jnp.eye(3, dtype=jnp.float32), jnp.eye(3, dtype=jnp.float32)])
    Ts = jnp.stack([jnp.zeros(3, jnp.float32), jnp.array([0.0, 0.02, 0.0], jnp.float32)])

    # block_k=128 with HW=1024 -> 8 K blocks: exercises nonzero band offsets, in-band
    # accumulation over several blocks, and the out-of-band skip path.
    voxel_feature = gridsample_forward(coords_3d, stereo_feat, Ps, Rs, Ts, (Himg, Wimg),
                                       tq=256, block_k=128)
    voxel_feature = jax.block_until_ready(voxel_feature)

    assert voxel_feature.shape == (N, n_img, C, GZ, GY, GX), voxel_feature.shape

    # The kernel samples bf16 features with bf16 weights (f32 accumulation); compare
    # against an f32 reference fed the same bf16-quantized features and weights.
    feat_q = np.asarray(stereo_feat.astype(jnp.bfloat16).astype(jnp.float32))
    ref = _numpy_reference(coords_3d, feat_q, Ps, Rs, Ts, Himg, Wimg)
    if not np.allclose(np.asarray(voxel_feature), ref, rtol=2e-2, atol=2e-2):
        raise AssertionError("Pallas grid-sample kernel mismatch vs reference, max abs diff = "
                             f"{np.max(np.abs(np.asarray(voxel_feature) - ref))}")

    print("KERNEL_OK")
</pallas_src>

<mosaic_0001>
module attributes {stable_mosaic.version = 11 : i64} {
  func.func @_gridsample_kernel(%arg0: i32, %arg1: i32, %arg2: i32, %arg3: memref<4xi32, #tpu.memory_space<smem>>, %arg4: memref<4xi32, #tpu.memory_space<smem>>, %arg5: memref<24xf32, #tpu.memory_space<smem>>, %arg6: memref<3x256xf32, #tpu.memory_space<vmem>>, %arg7: memref<1x16x128xbf16, #tpu.memory_space<vmem>>, %arg8: memref<1x16x256xf32, #tpu.memory_space<vmem>>, %arg9: memref<16x256xf32, #tpu.memory_space<vmem>>) attributes {dimension_semantics = [#tpu.dimension_semantics<parallel>, #tpu.dimension_semantics<parallel>, #tpu.dimension_semantics<arbitrary>], iteration_bounds = array<i64: 2, 2, 8>, scalar_prefetch = 2 : i64, scratch_operands = 1 : i64, tpu.core_type = #tpu.core_type<tc>, window_params = [{transform_indices = @transform_0, window_bounds = array<i64: 24>}, {transform_indices = @transform_1, window_bounds = array<i64: 3, 256>}, {transform_indices = @transform_2, window_bounds = array<i64: 1, 16, 128>}, {transform_indices = @transform_3, window_bounds = array<i64: 1, 16, 256>}]} {
    %c0_i32 = arith.constant 0 : i32
    %0 = arith.cmpi eq, %arg2, %c0_i32 : i32
    %1 = arith.extui %0 : i1 to i32
    %c0_i32_0 = arith.constant 0 : i32
    %2 = arith.cmpi ne, %1, %c0_i32_0 : i32
    scf.if %2 {
      %cst = arith.constant 0.000000e+00 : f32
      %13 = vector.broadcast %cst : f32 to vector<16x256xf32>
      %c0 = arith.constant 0 : index
      %c0_3 = arith.constant 0 : index
      %14 = vector.load %arg9[%c0, %c0_3] : memref<16x256xf32, #tpu.memory_space<vmem>>, vector<16x256xf32>
      tpu.vector_store %arg9[%c0, %c0_3], %13 {strides = array<i32>} : memref<16x256xf32, #tpu.memory_space<vmem>>, vector<16x256xf32>,
    } else {
    }
    %c2_i32 = arith.constant 2 : i32
    %3 = arith.muli %arg0, %c2_i32 : i32
    %4 = arith.addi %3, %arg1 : i32
    %5 = arith.index_cast %4 : i32 to index
    %6 = memref.load %arg4[%5] : memref<4xi32, #tpu.memory_space<smem>>
    %7 = arith.cmpi slt, %arg2, %6 : i32
    %8 = arith.extui %7 : i1 to i32
    %c0_i32_1 = arith.constant 0 : i32
    %9 = arith.cmpi ne, %8, %c0_i32_1 : i32
    scf.if %9 {
      %c12_i32 = arith.constant 12 : i32
      %13 = arith.muli %arg0, %c12_i32 : i32
      %c0 = arith.constant 0 : index
      %c0_3 = arith.constant 0 : index
      %14 = vector.load %arg6[%c0, %c0_3] : memref<3x256xf32, #tpu.memory_space<vmem>>, vector<3x256xf32>
      %15 = vector.extract_strided_slice %14 {offsets = [1, 0], sizes = [1, 256], strides = [1, 1]} : vector<3x256xf32> to vector<1x256xf32>
      %cst = arith.constant 0.000000e+00 : f32
      %16 = vector.broadcast %cst : f32 to vector<1x256xf32>
      %17 = arith.subf %16, %15 : vector<1x256xf32>
      %18 = vector.extract_strided_slice %14 {offsets = [2, 0], sizes = [1, 256], strides = [1, 1]} : vector<3x256xf32> to vector<1x256xf32>
      %cst_4 = arith.constant 0.000000e+00 : f32
      %19 = vector.broadcast %cst_4 : f32 to vector<1x256xf32>
      %20 = arith.subf %19, %18 : vector<1x256xf32>
      %21 = vector.extract_strided_slice %14 {offsets = [0, 0], sizes = [1, 256], strides = [1, 1]} : vector<3x256xf32> to vector<1x256xf32>
      %c2_i32_5 = arith.constant 2 : i32
      %22 = arith.addi %13, %c2_i32_5 : i32
      %23 = arith.index_cast %22 : i32 to index
      %24 = memref.load %arg5[%23] : memref<24xf32, #tpu.memory_space<smem>>
      %25 = vector.broadcast %24 : f32 to vector<1x256xf32>
      %26 = arith.mulf %17, %25 : vector<1x256xf32>
      %c3_i32 = arith.constant 3 : i32
      %27 = arith.addi %13, %c3_i32 : i32
      %c2_i32_6 = arith.constant 2 : i32
      %28 = arith.addi %27, %c2_i32_6 : i32
      %29 = arith.index_cast %28 : i32 to index
      %30 = memref.load %arg5[%29] : memref<24xf32, #tpu.memory_space<smem>>
      %31 = vector.broadcast %30 : f32 to vector<1x256xf32>
      %32 = arith.mulf %20, %31 : vector<1x256xf32>
      %33 = arith.addf %26, %32 : vector<1x256xf32>
      %c6_i32 = arith.constant 6 : i32
      %34 = arith.addi %13, %c6_i32 : i32
      %c2_i32_7 = arith.constant 2 : i32
      %35 = arith.addi %34, %c2_i32_7 : i32
      %36 = arith.index_cast %35 : i32 to index
      %37 = memref.load %arg5[%36] : memref<24xf32, #tpu.memory_space<smem>>
      %38 = vector.broadcast %37 : f32 to vector<1x256xf32>
      %39 = arith.mulf %21, %38 : vector<1x256xf32>
      %40 = arith.addf %33, %39 : vector<1x256xf32>
      %c9_i32 = arith.constant 9 : i32
      %41 = arith.addi %13, %c9_i32 : i32
      %c2_i32_8 = arith.constant 2 : i32
      %42 = arith.addi %41, %c2_i32_8 : i32
      %43 = arith.index_cast %42 : i32 to index
      %44 = memref.load %arg5[%43] : memref<24xf32, #tpu.memory_space<smem>>
      %45 = vector.broadcast %44 : f32 to vector<1x256xf32>
      %46 = arith.addf %40, %45 : vector<1x256xf32>
      %cst_9 = arith.constant 1.000000e+00 : f32
      %47 = vector.broadcast %cst_9 : f32 to vector<1x256xf32>
      %48 = arith.divf %47, %46 : vector<1x256xf32>
      %c0_i32_10 = arith.constant 0 : i32
      %49 = arith.addi %13, %c0_i32_10 : i32
      %50 = arith.index_cast %49 : i32 to index
      %51 = memref.load %arg5[%50] : memref<24xf32, #tpu.memory_space<smem>>
      %52 = vector.broadcast %51 : f32 to vector<1x256xf32>
      %53 = arith.mulf %17, %52 : vector<1x256xf32>
      %c3_i32_11 = arith.constant 3 : i32
      %54 = arith.addi %13, %c3_i32_11 : i32
      %c0_i32_12 = arith.constant 0 : i32
      %55 = arith.addi %54, %c0_i32_12 : i32
      %56 = arith.index_cast %55 : i32 to index
      %57 = memref.load %arg5[%56] : memref<24xf32, #tpu.memory_space<smem>>
      %58 = vector.broadcast %57 : f32 to vector<1x256xf32>
      %59 = arith.mulf %20, %58 : vector<1x256xf32>
      %60 = arith.addf %53, %59 : vector<1x256xf32>
      %c6_i32_13 = arith.constant 6 : i32
      %61 = arith.addi %13, %c6_i32_13 : i32
      %c0_i32_14 = arith.constant 0 : i32
      %62 = arith.addi %61, %c0_i32_14 : i32
      %63 = arith.index_cast %62 : i32 to index
      %64 = memref.load %arg5[%63] : memref<24xf32, #tpu.memory_space<smem>>
      %65 = vector.broadcast %64 : f32 to vector<1x256xf32>
      %66 = arith.mulf %21, %65 : vector<1x256xf32>
      %67 = arith.addf %60, %66 : vector<1x256xf32>
      %c9_i32_15 = arith.constant 9 : i32
      %68 = arith.addi %13, %c9_i32_15 : i32
      %c0_i32_16 = arith.constant 0 : i32
      %69 = arith.addi %68, %c0_i32_16 : i32
      %70 = arith.index_cast %69 : i32 to index
      %71 = memref.load %arg5[%70] : memref<24xf32, #tpu.memory_space<smem>>
      %72 = vector.broadcast %71 : f32 to vector<1x256xf32>
      %73 = arith.addf %67, %72 : vector<1x256xf32>
      %74 = arith.mulf %73, %48 : vector<1x256xf32>
      %c1_i32 = arith.constant 1 : i32
      %75 = arith.addi %13, %c1_i32 : i32
      %76 = arith.index_cast %75 : i32 to index
      %77 = memref.load %arg5[%76] : memref<24xf32, #tpu.memory_space<smem>>
      %78 = vector.broadcast %77 : f32 to vector<1x256xf32>
      %79 = arith.mulf %17, %78 : vector<1x256xf32>
      %c3_i32_17 = arith.constant 3 : i32
      %80 = arith.addi %13, %c3_i32_17 : i32
      %c1_i32_18 = arith.constant 1 : i32
      %81 = arith.addi %80, %c1_i32_18 : i32
      %82 = arith.index_cast %81 : i32 to index
      %83 = memref.load %arg5[%82] : memref<24xf32, #tpu.memory_space<smem>>
      %84 = vector.broadcast %83 : f32 to vector<1x256xf32>
      %85 = arith.mulf %20, %84 : vector<1x256xf32>
      %86 = arith.addf %79, %85 : vector<1x256xf32>
      %c6_i32_19 = arith.constant 6 : i32
      %87 = arith.addi %13, %c6_i32_19 : i32
      %c1_i32_20 = arith.constant 1 : i32
      %88 = arith.addi %87, %c1_i32_20 : i32
      %89 = arith.index_cast %88 : i32 to index
      %90 = memref.load %arg5[%89] : memref<24xf32, #tpu.memory_space<smem>>
      %91 = vector.broadcast %90 : f32 to vector<1x256xf32>
      %92 = arith.mulf %21, %91 : vector<1x256xf32>
      %93 = arith.addf %86, %92 : vector<1x256xf32>
      %c9_i32_21 = arith.constant 9 : i32
      %94 = arith.addi %13, %c9_i32_21 : i32
      %c1_i32_22 = arith.constant 1 : i32
      %95 = arith.addi %94, %c1_i32_22 : i32
      %96 = arith.index_cast %95 : i32 to index
      %97 = memref.load %arg5[%96] : memref<24xf32, #tpu.memory_space<smem>>
      %98 = vector.broadcast %97 : f32 to vector<1x256xf32>
      %99 = arith.addf %93, %98 : vector<1x256xf32>
      %100 = arith.mulf %99, %48 : vector<1x256xf32>
      %101 = math.absf %74 : vector<1x256xf32>
      %cst_23 = arith.constant 1.000000e+04 : f32
      %102 = vector.broadcast %cst_23 : f32 to vector<1x256xf32>
      %103 = arith.cmpf ogt, %101, %102 : vector<1x256xf32>
      %cst_24 = arith.constant -1.000000e+00 : f32
      %104 = vector.broadcast %cst_24 : f32 to vector<1x256xf32>
      %105 = arith.select %103, %104, %74 : vector<1x256xi1>, vector<1x256xf32>
      %106 = math.absf %100 : vector<1x256xf32>
      %cst_25 = arith.constant 1.000000e+04 : f32
      %107 = vector.broadcast %cst_25 : f32 to vector<1x256xf32>
      %108 = arith.cmpf ogt, %106, %107 : vector<1x256xf32>
      %cst_26 = arith.constant -1.000000e+00 : f32
      %109 = vector.broadcast %cst_26 : f32 to vector<1x256xf32>
      %110 = arith.select %108, %109, %100 : vector<1x256xi1>, vector<1x256xf32>
      %cst_27 = arith.constant 3.100000e+01 : f32
      %111 = vector.broadcast %cst_27 : f32 to vector<1x256xf32>
      %112 = arith.divf %105, %111 : vector<1x256xf32>
      %cst_28 = arith.constant 2.000000e+00 : f32
      %113 = vector.broadcast %cst_28 : f32 to vector<1x256xf32>
      %114 = arith.mulf %112, %113 : vector<1x256xf32>
      %cst_29 = arith.constant 1.000000e+00 : f32
      %115 = vector.broadcast %cst_29 : f32 to vector<1x256xf32>
      %116 = arith.subf %114, %115 : vector<1x256xf32>
      %cst_30 = arith.constant 3.100000e+01 : f32
      %117 = vector.broadcast %cst_30 : f32 to vector<1x256xf32>
      %118 = arith.divf %110, %117 : vector<1x256xf32>
      %cst_31 = arith.constant 2.000000e+00 : f32
      %119 = vector.broadcast %cst_31 : f32 to vector<1x256xf32>
      %120 = arith.mulf %118, %119 : vector<1x256xf32>
      %cst_32 = arith.constant 1.000000e+00 : f32
      %121 = vector.broadcast %cst_32 : f32 to vector<1x256xf32>
      %122 = arith.subf %120, %121 : vector<1x256xf32>
      %cst_33 = arith.constant 1.000000e+00 : f32
      %123 = vector.broadcast %cst_33 : f32 to vector<1x256xf32>
      %124 = arith.addf %116, %123 : vector<1x256xf32>
      %cst_34 = arith.constant 5.000000e-01 : f32
      %125 = vector.broadcast %cst_34 : f32 to vector<1x256xf32>
      %126 = arith.mulf %124, %125 : vector<1x256xf32>
      %cst_35 = arith.constant 3.100000e+01 : f32
      %127 = vector.broadcast %cst_35 : f32 to vector<1x256xf32>
      %128 = arith.mulf %126, %127 : vector<1x256xf32>
      %cst_36 = arith.constant 1.000000e+00 : f32
      %129 = vector.broadcast %cst_36 : f32 to vector<1x256xf32>
      %130 = arith.addf %122, %129 : vector<1x256xf32>
      %cst_37 = arith.constant 5.000000e-01 : f32
      %131 = vector.broadcast %cst_37 : f32 to vector<1x256xf32>
      %132 = arith.mulf %130, %131 : vector<1x256xf32>
      %cst_38 = arith.constant 3.100000e+01 : f32
      %133 = vector.broadcast %cst_38 : f32 to vector<1x256xf32>
      %134 = arith.mulf %132, %133 : vector<1x256xf32>
      %135 = arith.index_cast %4 : i32 to index
      %136 = memref.load %arg3[%135] : memref<4xi32, #tpu.memory_space<smem>>
      %137 = arith.addi %136, %arg2 : i32
      %c128_i32 = arith.constant 128 : i32
      %138 = arith.muli %137, %c128_i32 : i32
      %139 = arith.sitofp %138 : i32 to f32
      %140 = tpu.iota {dimensions = array<i32: 0>} : vector<128x1xi32>
      %141 = arith.sitofp %140 : vector<128x1xi32> to vector<128x1xf32>
      %142 = vector.broadcast %139 : f32 to vector<128x1xf32>
      %143 = arith.addf %141, %142 : vector<128x1xf32>
      %cst_39 = arith.constant 5.000000e-01 : f32
      %144 = vector.broadcast %cst_39 : f32 to vector<128x1xf32>
      %145 = arith.addf %143, %144 : vector<128x1xf32>
      %cst_40 = arith.constant 3.125000e-02 : f32
      %146 = vector.broadcast %cst_40 : f32 to vector<128x1xf32>
      %147 = arith.mulf %145, %146 : vector<128x1xf32>
      %148 = math.floor %147 : vector<128x1xf32>
      %cst_41 = arith.constant 3.200000e+01 : f32
      %149 = vector.broadcast %cst_41 : f32 to vector<128x1xf32>
      %150 = arith.mulf %148, %149 : vector<128x1xf32>
      %151 = arith.subf %143, %150 : vector<128x1xf32>
      %152 = vector.broadcast %128 : vector<1x256xf32> to vector<128x256xf32>
      %153 = vector.broadcast %151 : vector<128x1xf32> to vector<128x256xf32>
      %154 = arith.subf %152, %153 : vector<128x256xf32>
      %155 = math.absf %154 : vector<128x256xf32>
      %cst_42 = arith.constant 1.000000e+00 : f32
      %156 = vector.broadcast %cst_42 : f32 to vector<128x256xf32>
      %157 = arith.subf %156, %155 : vector<128x256xf32>
      %cst_43 = arith.constant 0.000000e+00 : f32
      %158 = vector.broadcast %cst_43 : f32 to vector<128x256xf32>
      %159 = arith.maximumf %158, %157 : vector<128x256xf32>
      %160 = vector.broadcast %134 : vector<1x256xf32> to vector<128x256xf32>
      %161 = vector.broadcast %148 : vector<128x1xf32> to vector<128x256xf32>
      %162 = arith.subf %160, %161 : vector<128x256xf32>
      %163 = math.absf %162 : vector<128x256xf32>
      %cst_44 = arith.constant 1.000000e+00 : f32
      %164 = vector.broadcast %cst_44 : f32 to vector<128x256xf32>
      %165 = arith.subf %164, %163 : vector<128x256xf32>
      %cst_45 = arith.constant 0.000000e+00 : f32
      %166 = vector.broadcast %cst_45 : f32 to vector<128x256xf32>
      %167 = arith.maximumf %166, %165 : vector<128x256xf32>
      %168 = arith.mulf %159, %167 : vector<128x256xf32>
      %c0_46 = arith.constant 0 : index
      %c0_47 = arith.constant 0 : index
      %169 = vector.load %arg9[%c0_46, %c0_47] : memref<16x256xf32, #tpu.memory_space<vmem>>, vector<16x256xf32>
      %c0_48 = arith.constant 0 : index
      %c0_49 = arith.constant 0 : index
      %c0_50 = arith.constant 0 : index
      %170 = vector.load %arg7[%c0_48, %c0_49, %c0_50] : memref<1x16x128xbf16, #tpu.memory_space<vmem>>, vector<1x16x128xbf16>
      %171 = vector.shape_cast %170 : vector<1x16x128xbf16> to vector<16x128xbf16>
      %172 = arith.truncf %168 : vector<128x256xf32> to vector<128x256xbf16>
      %cst_51 = arith.constant dense<0.000000e+00> : vector<16x256xf32>
      %173 = tpu.matmul %171, %172, %cst_51 {dimension_numbers = #tpu.dot_dimension_numbers<[1], [0], [0], [1], [0, 0, 1, 1], [], []>} : vector<16x128xbf16>, vector<128x256xbf16>, vector<16x256xf32> -> vector<16x256xf32>
      %174 = arith.addf %169, %173 : vector<16x256xf32>
      %c0_52 = arith.constant 0 : index
      %c0_53 = arith.constant 0 : index
      %175 = vector.load %arg9[%c0_52, %c0_53] : memref<16x256xf32, #tpu.memory_space<vmem>>, vector<16x256xf32>
      tpu.vector_store %arg9[%c0_52, %c0_53], %174 {strides = array<i32>} : memref<16x256xf32, #tpu.memory_space<vmem>>, vector<16x256xf32>,
    } else {
    }
    %c7_i32 = arith.constant 7 : i32
    %10 = arith.cmpi eq, %arg2, %c7_i32 : i32
    %11 = arith.extui %10 : i1 to i32
    %c0_i32_2 = arith.constant 0 : i32
    %12 = arith.cmpi ne, %11, %c0_i32_2 : i32
    scf.if %12 {
      %c0 = arith.constant 0 : index
      %c0_3 = arith.constant 0 : index
      %13 = vector.load %arg9[%c0, %c0_3] : memref<16x256xf32, #tpu.memory_space<vmem>>, vector<16x256xf32>
      %c0_4 = arith.constant 0 : index
      %c0_5 = arith.constant 0 : index
      %c0_6 = arith.constant 0 : index
      %14 = vector.load %arg8[%c0_4, %c0_5, %c0_6] : memref<1x16x256xf32, #tpu.memory_space<vmem>>, vector<1x16x256xf32>
      %15 = vector.shape_cast %14 : vector<1x16x256xf32> to vector<16x256xf32>
      %16 = vector.shape_cast %13 : vector<16x256xf32> to vector<1x16x256xf32>
      tpu.vector_store %arg8[%c0_4, %c0_5, %c0_6], %16 {strides = array<i32>} : memref<1x16x256xf32, #tpu.memory_space<vmem>>, vector<1x16x256xf32>,
    } else {
    }
    return
  }
  func.func @transform_0(%arg0: i32, %arg1: i32, %arg2: i32, %arg3: memref<4xi32, #tpu.memory_space<smem>>, %arg4: memref<4xi32, #tpu.memory_space<smem>>) -> i32 {
    %c0_i32 = arith.constant 0 : i32
    %c0_i32_0 = arith.constant 0 : i32
    return %c0_i32 : i32
  }
  func.func @transform_1(%arg0: i32, %arg1: i32, %arg2: i32, %arg3: memref<4xi32, #tpu.memory_space<smem>>, %arg4: memref<4xi32, #tpu.memory_space<smem>>) -> (i32, i32) {
    %c0_i32 = arith.constant 0 : i32
    %c0_i32_0 = arith.constant 0 : i32
    return %c0_i32, %arg1 : i32, i32
  }
  func.func @transform_2(%arg0: i32, %arg1: i32, %arg2: i32, %arg3: memref<4xi32, #tpu.memory_space<smem>>, %arg4: memref<4xi32, #tpu.memory_space<smem>>) -> (i32, i32, i32) {
    %c2_i32 = arith.constant 2 : i32
    %0 = arith.muli %arg0, %c2_i32 : i32
    %1 = arith.addi %0, %arg1 : i32
    %2 = arith.index_cast %1 : i32 to index
    %3 = memref.load %arg3[%2] : memref<4xi32, #tpu.memory_space<smem>>
    %c2_i32_0 = arith.constant 2 : i32
    %4 = arith.muli %arg0, %c2_i32_0 : i32
    %5 = arith.addi %4, %arg1 : i32
    %6 = arith.index_cast %5 : i32 to index
    %7 = memref.load %arg4[%6] : memref<4xi32, #tpu.memory_space<smem>>
    %c1_i32 = arith.constant 1 : i32
    %8 = arith.subi %7, %c1_i32 : i32
    %9 = arith.minsi %arg2, %8 : i32
    %10 = arith.addi %3, %9 : i32
    %c0_i32 = arith.constant 0 : i32
    %c0_i32_1 = arith.constant 0 : i32
    return %arg0, %c0_i32, %10 : i32, i32, i32
  }
  func.func @transform_3(%arg0: i32, %arg1: i32, %arg2: i32, %arg3: memref<4xi32, #tpu.memory_space<smem>>, %arg4: memref<4xi32, #tpu.memory_space<smem>>) -> (i32, i32, i32) {
    %c0_i32 = arith.constant 0 : i32
    %c0_i32_0 = arith.constant 0 : i32
    return %arg0, %c0_i32, %arg1 : i32, i32, i32
  }
}

</mosaic_0001>

<bundles_post_ra>
// kernel: tpu_custom_call.1
= control target key start
LH: loop header
LB: loop body
LE: loop exit
PB: predicated region body
PF: predicated region fallthrough
CT: control target
= control target key end

     0   :  { %s1605_s18 = smov [#allocation4]   ;;  %s2459_s0 = inlined_call_operand.hbm [shape: s32[4], index: 0, kind: input, shape index: {}]   ;;  %s2460_s2 = inlined_call_operand.vmem [shape: f32[24], index: 2, kind: input, shape index: {}]   ;;  %s2461_s3 = inlined_call_operand.hbm [shape: f32[3,512], index: 3, kind: input, shape index: {}]   ;;  %s2462_s4 = inlined_call_operand.hbm [shape: bf16[2,16,1024], index: 4, kind: input, shape index: {}]   ;;  %s2463_s5 = inlined_call_operand.hbm [shape: f32[2,16,512], index: 5, kind: output, shape index: {}]   ;;  %s2464_s1 = inlined_call_operand.vmem [shape: s32[4], index: 1, kind: input, shape index: {}]  }
   0x1   :  { %2493 = sst [smem:[#allocation41_spill]] %s2460_s2  ;;  %s12_s23 = sshll.u32 %s2464_s1, 4  ;;  %s13_s23 = int_to_ptr.vmem [resolvable:$true] %s12_s23 }
   0x2   :  { %2494 = sst [smem:[#allocation42_spill]] %s2462_s4  ;;  %s1350_s24 = scalar_lea.vmem %s13_s23, 16 }
   0x3   :  { %2495 = sst [smem:[#allocation43_spill]] %s2463_s5  ;;  %p1351_p0 = scmp.ne.s32.totalorder %s13_s23, %s1350_s24 }
   0x4   :  { %11 = dma.hbm_to_smem %s2459_s0, 16, %s1605_s18, [#allocation3] }
   0x5   :  { %p1355_p1 = scmp.lt.s32.totalorder %s13_s23, %s13_s23  ;;  %p1356_p2 = scmp.lt.s32.totalorder %s1350_s24, %s1350_s24 }
   0x7   :  { %p1357_p3 = por %p1356_p2, %p1355_p1 }
   0x9   :  { %p1358_p4 = pnand %p1357_p3, %p1351_p0 }
   0xb   :  { %1361 = shalt.err (!%p1358_p4)  }
   0xc   :  { %s1606_s25 = smov [#allocation5]  }
   0xd   :  { %15 = dma.vmem_to_smem %s13_s23, 16, %s1606_s25, [#allocation3] }
   0xe   :  { %1523 = dma.done.wait [#allocation3], 32 }
   0xf   :  { %1524 = vsyncadd [#allocation3], 4294967264 }
  0x10   :  { %17 = sfence }
  0x11   :  { %18 = vsyncpa [#allocation9], 0 }
  0x12   :  { %19 = vsyncpa [#allocation7], 0 }
  0x13   :  { %21 = vsyncpa [#allocation7 + $0x1], 0 }
  0x14   :  { %22 = vsyncpa [#allocation12], 0 }
  0x15   :  { %24 = vsyncpa [#allocation12 + $0x1], 0 }
  0x16   :  { %25 = vsyncpa [#allocation8], 0 }
  0x17   :  { %27 = vsyncpa [#allocation8 + $0x1], 0  ;;  %s1655_s0 = smov 0   ;;  %s1657_s1 = smov 0  }
  0x18   :  { %s1659_s26 = smov 0   ;;  %s1661_s27 = smov 0  }
  0x19   :  { %s1663_s28 = smov 0   ;;  %s1665_s29 = smov 0  }
  0x1a   :  { %s1667_s30 = smov 0   ;;  %s1669_s6 = smov 0  }
  0x1b   :  { %s1671_s7 = smov 0   ;;  %s1673_s8 = smov 0  }
  0x1c   :  { %s1675_s9 = smov 0   ;;  %s1677_s10 = smov 0  }
  0x1d   :  { %s1679_s11 = smov 0   ;;  %s1681_s12 = smov 0  }
  0x1e   :  { %s1683_s13 = smov 0   ;;  %s1685_s14 = smov 0  }
  0x1f LB: > { %2496 = sst [smem:[#allocation23_spill]] %s1543_s0  ;;  %s1123_s15 = sadd.s32 4294967295, %s1603_s14   ;;  %s1603_s14 = sphi %s1685_s14, %s33_s14   ;;  %s1599_s13 = sphi %s1683_s13, %s2571_s13   ;;  %s1595_s12 = sphi %s1681_s12, %s2570_s12   ;;  %s1591_s11 = sphi %s1679_s11, %s2578_s11   ;;  %s1587_s10 = sphi %s1677_s10, %s2569_s10   ;;  %s1583_s9 = sphi %s1675_s9, %s2568_s9   ;;  %s1579_s8 = sphi %s1673_s8, %s2577_s8   ;;  %s1575_s7 = sphi %s1671_s7, %s2567_s7   ;;  %s1571_s6 = sphi %s1669_s6, %s2566_s6   ;;  %s1567_s30 = sphi %s1667_s30, %s2565_s30   ;;  %s1563_s29 = sphi %s1665_s29, %s2576_s29   ;;  %s1559_s28 = sphi %s1663_s28, %s2575_s28   ;;  %s1555_s27 = sphi %s1661_s27, %s2574_s27   ;;  %s1551_s26 = sphi %s1659_s26, %s2573_s26   ;;  %s1547_s1 = sphi %s1657_s1, %s2572_s1   ;;  %s1543_s0 = sphi %s1655_s0, %s2564_s0  }
  0x20   : > { %2497 = sst [smem:[#allocation24_spill]] %s1547_s1  ;;  %s1124_s16 = sadd.s32 4294967294, %s1603_s14  }
  0x21   : > { %2498 = sst [smem:[#allocation25_spill]] %s1571_s6  ;;  %p1735_p5 = scmp.eq.s32.totalorder %s1123_s15, 0 }
  0x22   : > { %2499 = sst [smem:[#allocation26_spill]] %s1575_s7  ;;  %p137_p6 = scmp.ne.s32.totalorder %s1559_s28, %s1555_s27 }
  0x23   : > { %2500 = sst [smem:[#allocation27_spill]] %s1579_s8  ;;  %p162_p7 = scmp.ne.s32.totalorder %s1551_s26, %s1547_s1 }
  0x24   : > { %2501 = sst [smem:[#allocation28_spill]] %s1583_s9  ;;  %p1744_p8 = por %p137_p6, %p1735_p5 }
  0x25   : > { %2502 = sst [smem:[#allocation29_spill]] %s1587_s10  ;;  %p163_p9 = scmp.eq.s32.totalorder %s1123_s15, 31 }
  0x26   : > { %2503 = sst [smem:[#allocation30_spill]] %s1595_s12  ;;  %p168_p10 = scmp.ne.s32.totalorder %s1547_s1, %s1543_s0 }
  0x27   : > { %2504 = sst [smem:[#allocation31_spill]] %s1599_s13  ;;  %p169_p11 = scmp.eq.s32.totalorder %s1124_s16, 31 }
  0x28   : > { %s2505_s17 = scalar_select %p1735_p5, 1, 0 }
  0x29   : > { %s2507_s18 = scalar_select %p1744_p8, 1, 0 }
  0x2a   : > { %2506 = sst [smem:[#allocation32_spill]] %s2505_s17  ;;  %p1750_p12 = por %p163_p9, %p162_p7 }
  0x2b   : > { %2508 = sst [smem:[#allocation33_spill]] %s2507_s18  ;;  %p1129_p13 = scmp.ge.s32.totalorder %s1603_s14, 1 }
  0x2c   : > { %s2509_s19 = scalar_select %p1750_p12, 1, 0 }
  0x2d   : > { %p1755_p0 = por %p169_p11, %p168_p10  ;;  %p176_p1 = scmp.lt.s32.totalorder %s1603_s14, 33 }
  0x2e   : > { %2510 = sst [smem:[#allocation34_spill]] %s2509_s19 }
  0x2f   : > { %s2511_s20 = scalar_select %p1755_p0, 1, 0 }
  0x30   : > { %s2513_s2 = sld [smem:[#allocation41_spill]]  ;;  %p1764_p2 = pnand %p1129_p13, %p176_p1 }
  0x31   : > { %2512 = sst [smem:[#allocation35_spill]] %s2511_s20 }
  0x32   : > { %s2514_s25 = scalar_select %p1764_p2, 1, 0 }
  0x33   : > { %p1177_p3 = pneg %p1764_p2 }
  0x34   : > { %2515 = sst [smem:[#allocation36_spill]] %s2514_s25 }
  0x35   : > { %p1178_p4 = pnand %p1177_p3, %p1735_p5 }
  0x36   : > { %s189_s23 = sshll.u32 %s2513_s2, 4  ;;  %s190_s23 = int_to_ptr.vmem [resolvable:$true] %s189_s23 }
  0x37   : > { %s1362_s27 = scalar_lea.vmem %s190_s23, 16  ;;  %p1364_p7 = pneg %p1178_p4 }
  0x38   : > { %p1363_p6 = scmp.ne.s32.totalorder %s190_s23, %s1362_s27  ;;  %p1370_p11 = scmp.lt.s32.totalorder %s190_s23, %s190_s23 }
  0x39   : > { %p1371_p0 = scmp.lt.s32.totalorder %s1362_s27, %s1362_s27 }
  0x3a   : > { %p1365_p9 = pnand %p1364_p7, %p1363_p6 }
  0x3b   : > { %p1372_p12 = por %p1371_p0, %p1370_p11 }
  0x3c   : > { %p1366_p10 = pneg %p1365_p9 }
  0x3e   : > { %p1373_p8 = pnand %p1372_p12, %p1366_p10 }
  0x40   : > { %1376 = shalt.err (!%p1373_p8)
}
  0x41   : > { %s1607_s15 = smov [#allocation6]   ;;  %s45_s16 = sadd.s32 1, %s1591_s11 }
  0x42   : > { %1180 = dma.vmem_to_smem (!%p1178_p4), %s190_s23, 16, %s1607_s15, [#allocation9]  }
  0x43   : > { %p46_p13 = scmp.ge.s32.totalorder %s45_s16, 8  ;;  %s48_s21 = sadd.s32 1, %s1595_s12 }
  0x44   : > { %s52_s22 = sadd.s32 1, %s1599_s13  ;;  %s80_s27 = sadd.s32 1, %s1575_s7 }
  0x45   : > { %s2580_s16 = smov (%p46_p13, %s45_s16), 0  ;;  %s2582_s21 = smov (!%p46_p13, %s48_s21), %s1595_s12 }
  0x46   : > { %p87_p8 = scmp.ne.s32.totalorder %s1575_s7, %s1571_s6  ;;  %p50_p12 = scmp.ge.s32.totalorder %s2582_s21, 2 }
  0x47   : > { %p93_p0 = scmp.ne.s32.totalorder %s1571_s6, %s1567_s30  ;;  %p88_p1 = scmp.eq.s32.totalorder %s1603_s14, 0 }
  0x48   : > { %s1125_s24 = sshll.u32 %s1599_s13, 1  ;;  %s2584_s21 = smov (%p50_p12, %s2582_s21), 0 }
  0x49   : > { %2516 = sst [smem:[#allocation37_spill]] %s2584_s21  ;;  %s2586_s22 = smov (!%p50_p12, %s52_s22), %s1599_s13 }
  0x4a   : > { %s77_s23 = ssub.s32 %s1595_s12, %s2584_s21  ;;  %p1792_p3 = por %p1735_p5, %p93_p0 }
  0x4b   : > { %p54_p4 = scmp.ge.s32.totalorder %s2586_s22, 2  ;;  %p78_p6 = scmp.eq.s32.totalorder %s77_s23, 0 }
  0x4c   : > { %s2517_s15 = scalar_select %p1792_p3, 1, 0 }
  0x4d   : > { %p1798_p7 = por %p88_p1, %p87_p8  ;;  %s1803_s2 = sadd.s32 %s1595_s12, %s1125_s24 }
  0x4e   : > { %2518 = sst [smem:[#allocation38_spill]] %s2517_s15  ;;  %s2588_s22 = smov (%p54_p4, %s2586_s22), 0 }
  0x4f   : > { %2520 = sst [smem:[#allocation39_spill]] %s2588_s22  ;;  %s1127_s5 = sshll.u32 %s2588_s22, 1 }
  0x50   : > { %s1808_s20 = scalar_select %p78_p6, %s1575_s7, %s80_s27  }
  0x51   : > { %s1811_s0 = sld [smem:[#allocation4 + %s1803_s2]]  ;;  %s112_s9 = sadd.s32 %s1127_s5, %s2584_s21 }
  0x52   : > { %2521 = sst [smem:[#allocation40_spill]] %s1808_s20  ;;  %s119_s24 = ssub.s32 %s1599_s13, %s2588_s22 }
  0x53   : > { %s106_s19 = sld [smem:[#allocation5 + %s1803_s2]]  ;;  %p131_p9 = scmp.ne.s32.totalorder %s1563_s29, %s1559_s28 }
  0x54   : > { %s113_s10 = sld [smem:[#allocation4 + %s112_s9]]  ;;  %s149_s18 = sor.u32 %s119_s24, %s77_s23 }
  0x55   : > { %s114_s8 = sld [smem:[#allocation5 + %s112_s9]]  ;;  %p1821_p10 = scmp.eq.s32.totalorder %s149_s18, 0 }
  0x56   : > { %p2488_p11 = scmp.lt.s32.totalorder %s1603_s14, 32  ;;  %s200_s20 = sand.u32 1, %s1575_s7  }
  0x57   : > { %s1162_s15 = sshll.u32 %s1595_s12, 7  ;;  %s1132_s9 = sshll.u32 %s200_s20, 3 }
  0x58   : > { %s1834_s21 = scalar_lea.hbm %s2461_s3, %s1162_s15  ;;  %s204_s17 = scalar_lea.vmem [#allocation10], %s1132_s9 }
  0x59   : > { %s1126_s5 = sadd.s32 4294967295, %s106_s19  ;;  %s212_s7 = sshll.u32 %s204_s17, 4  ;;  %s213_s7 = int_to_ptr.vmem [resolvable:$true] %s212_s7 }
  0x5a   : > { %p108_p13 = scmp.lt.s32.totalorder %s1591_s11, %s1126_s5  ;;  %s2523_s25 = sadd.s32 1, %s1551_s26 }
  0x5b   : > { %s1128_s1 = sadd.s32 4294967295, %s114_s8  ;;  %p1849_p12 = pnand %p2488_p11, %p1798_p7 }
  0x5c   : > { %s109_s23 = scalar_select %p108_p13, %s1591_s11, %s1126_s5 }
  0x5d   : > { %p116_p8 = scmp.lt.s32.totalorder %s2580_s16, %s1128_s1  ;;  %p1858_p0 = por %p131_p9, %p88_p1 }
  0x5e   : > { %s110_s6 = sadd.s32 %s109_s23, %s1811_s0  ;;  %p1379_p6 = pneg %p1849_p12 }
  0x5f   : > { %s117_s12 = scalar_select %p116_p8, %s2580_s16, %s1128_s1 }
  0x60   : > { %s1843_s19 = scalar_select %p1821_p10, %s1551_s26, %s2523_s25  }
  0x61   : > { %s118_s4 = sadd.s32 %s117_s12, %s113_s10  ;;  %s201_s10 = scalar_lea.sflag [#allocation7], %s200_s20 }
  0x62   : > { %s120_s13 = ssub.s32 %s110_s6, %s118_s4  ;;  %s1390_s4 = scalar_lea.vmem %s213_s7, 128 }
  0x63   : > { %s121_s22 = sor.u32 %s120_s13, %s119_s24  ;;  %p1391_p7 = scmp.ne.s32.totalorder %s213_s7, %s1390_s4 }
  0x64   : > { %p1862_p4 = scmp.eq.s32.totalorder %s121_s22, 0  ;;  %s1608_s6 = smov [#allocation10]  }
  0x65   : > { %p1393_p10 = pnand %p1391_p7, %p1379_p6  ;;  %s1395_s12 = sshll.u32 %s1608_s6, 4  ;;  %s1396_s12 = int_to_ptr.vmem [resolvable:$false] %s1395_s12 }
  0x66   : > { %s1397_s13 = scalar_lea.vmem %s1396_s12, 256  ;;  %p1398_p8 = scmp.lt.s32.totalorder %s213_s7, %s1396_s12 }
  0x67   : > { %p1394_p13 = pneg %p1393_p10  ;;  %p1399_p1 = scmp.lt.s32.totalorder %s1397_s13, %s1390_s4 }
  0x69   : > { %p1400_p9 = por %p1399_p1, %p1398_p8 }
  0x6b   : > { %p1401_p11 = pnand %p1400_p9, %p1394_p13 }
  0x6d   : > { %1404 = shalt.err (!%p1401_p11)
}
  0x6e   : > { %1184 = dma.hbm_to_vmem [thread:$0]  (!%p1849_p12), %s1834_s21, 128, %s213_s7, %s201_s10  }
  0x6f   : > { %s2527_s17 = sadd.s32 1, %s1563_s29  ;;  %p2528_p11 = scmp.lt.s32.totalorder %s1603_s14, 32 }
  0x70   : > { %s1876_s20 = scalar_select %p1862_p4, %s1563_s29, %s2527_s17  }
  0x71   : > { %s2529_s25 = sld [smem:[#allocation31_spill]]  ;;  %p1882_p6 = pnand %p2528_p11, %p1858_p0 }
  0x72   : > { %s2590_s2 = smov (!%p1858_p0, %s1803_s2), 0  ;;  %p2531_p7 = pmov %p2528_p11 }
  0x73   : > { %s1168_s30 = scalar_select %p1858_p0, [#allocation5], [#allocation15] }
  0x74   : > { %s1166_s24 = scalar_select %p1858_p0, [#allocation4], [#allocation14] }
  0x75   : > { %s2592_s2 = smov (!%p2531_p7, %s2590_s2), 0  ;;  %s219_s7 = sand.u32 1, %s1563_s29  }
  0x76   : > { %p2532_p12 = pmov %p2531_p7  ;;  %p2533_p4 = pmov %p2531_p7 }
  0x77   : > { %s1135_s27 = sshll.u32 %s219_s7, 3  ;;  %s1138_s8 = sshll.u32 %s2529_s25, 4 }
  0x78   : > { %s2594_s30 = smov (!%p2532_p12, %s1168_s30), [#allocation17]  ;;  %s2596_s24 = smov (!%p2533_p4, %s1166_s24), [#allocation16] }
  0x79   : > { %s227_s21 = sld [smem:[%s2594_s30 + %s2592_s2]]  ;;  %s223_s23 = scalar_lea.vmem [#allocation11], %s1135_s27 }
  0x7a   : > { %s226_s5 = sld [smem:[%s2596_s24 + %s2592_s2]]  ;;  %s239_s18 = sshll.u32 %s223_s23, 4  ;;  %s1903_s18 = int_to_ptr.vmem [resolvable:$true] %s239_s18 }
  0x7b   : > { %s2534_s12 = sld [smem:[#allocation42_spill]]  ;;  %s1910_s2 = scalar_lea.sflag [#allocation12], %s219_s7 }
  0x7c   : > { %p1407_p13 = pneg %p1882_p6 }
  0x7f   : > { %s1137_s9 = sadd.s32 4294967295, %s227_s21 }
  0x80   : > { %p229_p10 = scmp.lt.s32.totalorder %s1591_s11, %s1137_s9 }
  0x81   : > { %s2535_s17 = smov %s2534_s12 }
  0x82   : > { %s230_s22 = scalar_select %p229_p10, %s1591_s11, %s1137_s9 }
  0x83   : > { %s1410_s21 = scalar_lea.hbm %s2535_s17, 2048 }
  0x84   : > { %s231_s0 = sadd.s32 %s230_s22, %s226_s5 }
  0x85   : > { %s236_s1 = sadd.s32 %s1138_s8, %s231_s0 }
  0x86   : > { %s1139_s10 = sshll.u32 %s236_s1, 6 }
  0x87   : > { %s1908_s13 = scalar_lea.hbm %s2534_s12, %s1139_s10 }
  0x88   : > { %s1405_s30 = scalar_lea.hbm %s1908_s13, 128  ;;  %p1411_p9 = scmp.lt.s32.totalorder %s1908_s13, %s2535_s17 }
  0x89   : > { %p1406_p0 = scmp.ne.s32.totalorder %s1908_s13, %s1405_s30  ;;  %p1412_p11 = scmp.lt.s32.totalorder %s1410_s21, %s1405_s30 }
  0x8b   : > { %p1408_p8 = pnand %p1407_p13, %p1406_p0  ;;  %p1413_p7 = por %p1412_p11, %p1411_p9 }
  0x8d   : > { %p1409_p1 = pneg %p1408_p8 }
  0x8f   : > { %p1414_p12 = pnand %p1413_p7, %p1409_p1 }
  0x91   : > { %1417 = shalt.err (!%p1414_p12)
}
  0x92   : > { %s1418_s7 = scalar_lea.vmem %s1903_s18, 128  ;;  %s1609_s9 = smov [#allocation11]  }
  0x93   : > { %p1419_p4 = scmp.ne.s32.totalorder %s1903_s18, %s1418_s7  ;;  %s1423_s23 = sshll.u32 %s1609_s9, 4  ;;  %s1424_s23 = int_to_ptr.vmem [resolvable:$false] %s1423_s23 }
  0x94   : > { %s1425_s8 = scalar_lea.vmem %s1424_s23, 256  ;;  %p1426_p8 = scmp.lt.s32.totalorder %s1903_s18, %s1424_s23 }
  0x95   : > { %p1421_p10 = pnand %p1419_p4, %p1407_p13  ;;  %p1427_p3 = scmp.lt.s32.totalorder %s1425_s8, %s1418_s7 }
  0x97   : > { %p1422_p0 = pneg %p1421_p10  ;;  %p1428_p5 = por %p1427_p3, %p1426_p8 }
  0x99   : > { %p1429_p2 = pnand %p1428_p5, %p1422_p0 }
  0x9b   : > { %1432 = shalt.err (!%p1429_p2)
}
  0x9c   : > { %s1610_s22 = smov 512   ;;  %s1611_s0 = smov 64  }
  0x9d   : > { %s1612_s1 = smov 4   ;;  %s2536_s10 = sld [smem:[#allocation36_spill]] }
  0x9e   : > { %1191 = dma.hbm_to_vmem [thread:$0]  (!%p1882_p6), %s1908_s13, 128, %s1903_s18, %s1910_s2, %s1610_s22, %s1611_s0, %s1612_s1  }
  0xa3   : > { %p2537_p13 = scmp.ne.s32.totalorder %s2536_s10, 0 }
  0xa4   : > { %s2538_s4 = sld [smem:[#allocation32_spill]] (!%p2537_p13) }
  0xa5   : > { %251 = sbr.rel (%p2537_p13) target bundleno = 624 (0x270), region = 32 }
  0xaa   : > { %p2539_p1 = scmp.ne.s32.totalorder %s2538_s4, 0 }
  0xac   : > { %1526 = dma.done.wait (%p2539_p1), [#allocation9], 16  }
  0xad   : > { %1528 = vsyncadd (%p2539_p1), [#allocation9], 4294967280  ;;  %s2540_s6 = sld [smem:[#allocation25_spill]] }
  0xae   : > { %s2541_s12 = sld [smem:[#allocation38_spill]] }
  0xb3   : > { %s257_s30 = sand.u32 1, %s2540_s6  }
  0xb4   : > { %s1938_s25 = sshll.u32 %s257_s30, 3  ;;  %s258_s24 = scalar_lea.sflag [#allocation7], %s257_s30 }
  0xb5   : > { %s261_s21 = scalar_lea.vmem [#allocation10], %s1938_s25  ;;  %p2542_p5 = scmp.ne.s32.totalorder %s2541_s12, 0 }
  0xb7   : > { %1530 = dma.done.wait (%p2542_p5), %s258_s24, 128  }
  0xb8   : > { %1532 = vsyncadd (%p2542_p5), %s258_s24, 4294967168  ;;  %s2543_s15 = sld [smem:[#allocation33_spill]]  ;;  %s266_s18 = sand.u32 1, %s1559_s28  }
  0xb9   : > { %s1946_s13 = sshll.u32 %s266_s18, 3  ;;  %s267_s2 = scalar_lea.sflag [#allocation12], %s266_s18 }
  0xba   : > { %s270_s27 = scalar_lea.vmem [#allocation11], %s1946_s13 }
  0xbe   : > { %p2544_p2 = scmp.ne.s32.totalorder %s2543_s15, 0 }
  0xc0   : > { %1534 = dma.done.wait (%p2544_p2), %s267_s2, 128  }
  0xc1   : > { %1536 = vsyncadd (%p2544_p2), %s267_s2, 4294967168 }
  0xc2   : > { %275 = sfence }
  0xc3   : > { %s2545_s5 = sld [smem:[#allocation24_spill]] }
  0xc4   : > { %s2546_s8 = sld [smem:[#allocation27_spill]] }
  0xc9   : > { %s296_s7 = sand.u32 1, %s2545_s5  }
  0xca   : > { %s1144_s9 = sshll.u32 %s296_s7, 5  ;;  %p1145_p3 = scmp.ne.s32.totalorder %s2546_s8, 0 }
  0xcb   : > { %s1956_s23 = scalar_lea.vmem [#allocation13], %s1144_s9 }
  0xcc   : > { %313 = sbr.rel (%p1145_p3) target bundleno = 212 (0xd4), region = 48 }
  0xd1   : > { %v1613_v0 = vmov 0.0  }
  0xd2   : > { %314 = vst [vmem:[#allocation2 + $0x10] sm:$0xff] %v1613_v0  ;;  %315 = vst [vmem:[#allocation2] sm:$0xff] %v1613_v0 }
  0xd3   : > { %316 = vst [vmem:[#allocation2 + $0x18] sm:$0xff] %v1613_v0  ;;  %317 = vst [vmem:[#allocation2 + $0x8] sm:$0xff] %v1613_v0 }
  0xd4 PF: > { %s2547_s22 = sld [smem:[#allocation29_spill]] }
  0xd5   : > { %s2548_s0 = sld [smem:[#allocation28_spill]] }
  0xd6   : > { %s2549_s6 = sld [smem:[#allocation27_spill]] }
  0xda   : > { %s1146_s1 = sshll.u32 %s2547_s22, 1 }
  0xdb   : > { %s319_s10 = sadd.s32 %s2548_s0, %s1146_s1 }
  0xdc   : > { %s320_s4 = sld [smem:[#allocation5 + %s319_s10]] }
  0xe2   : > { %p1147_p6 = scmp.ge.s32.totalorder %s2549_s6, %s320_s4 }
  0xe3   : > { %s2550_s12 = sld [smem:[#allocation29_spill]] (!%p1147_p6) }
  0xe4   : > { %324 = sbr.rel (%p1147_p6) target bundleno = 577 (0x241), region = 52  ;;  %s1965_s24 = sld [smem:[#allocation4 + %s319_s10]] (!%p1147_p6) }
  0xe9   : > { %s1963_s30 = smul.u32 12, %s2550_s12  ;;  %v429_v1 = vlaneseq  ;;  %v1974_v3 = vld [vmem:[%s261_s21] sm:$0x77]  ;;  %v1614_v44 = vmov 0  }
  0xea   : > { %v327_v5 = vsub.f32 0.0, %v1974_v3  ;;  %945 = vmatprep.mubr.bf16.mxu0 %v1614_v44 }
  0xeb   : > { %s328_s15 = sadd.s32 2, %s1963_s30  ;;  %s332_s18 = sadd.s32 5, %s1963_s30  ;;  %v1969_v2 = vshrl.u32 %v429_v1, 7 }
  0xec   : > { %s329_s2 = sld [smem:[#allocation6 + %s328_s15]]  ;;  %s341_s5 = sadd.s32 8, %s1963_s30 }
  0xed   : > { %s333_s9 = sld [smem:[#allocation6 + %s332_s18]]  ;;  %s349_s8 = sadd.s32 11, %s1963_s30  ;;  %v444_v4 = vadd.s32 112, %v1969_v2  ;;  %v445_v6 = vadd.s32 120, %v1969_v2  ;;  %v1991_v7 = vadd.s32 96, %v1969_v2  ;;  %v1994_v8 = vadd.s32 104, %v1969_v2 }
  0xee   : > { %s342_s22 = sld [smem:[#allocation6 + %s341_s5]]  ;;  %s358_s0 = sadd.s32 3, %s1963_s30  ;;  %v2000_v10 = vadd.s32 80, %v1969_v2  ;;  %v2003_v11 = vadd.s32 88, %v1969_v2  ;;  %v2006_v12 = vadd.s32 64, %v1969_v2  ;;  %v2010_v15 = vsub.s32 1, %v1969_v2 }
  0xef   : > { %s1978_s1 = sld [smem:[#allocation6 + %s349_s8]]  ;;  %s367_s4 = sadd.s32 6, %s1963_s30  ;;  %v460_v14 = vcvt.s32.f32 %v444_v4  ;;  %v566_v16 = vsub.s32 5, %v1969_v2  ;;  %v461_v20 = vcvt.s32.f32 %v445_v6  ;;  %v458_v22 = vcvt.s32.f32 %v1991_v7 }
  0xf0   : > { %s1984_s10 = sld [smem:[#allocation6 + %s1963_s30]]  ;;  %s380_s21 = sadd.s32 1, %s1963_s30  ;;  %v459_v23 = vcvt.s32.f32 %v1994_v8  ;;  %v2023_v24 = vadd.s32 72, %v1969_v2  ;;  %v456_v26 = vcvt.s32.f32 %v2000_v10  ;;  %v457_v27 = vcvt.s32.f32 %v2003_v11 }
  0xf1   : > { %s1987_s25 = sld [smem:[#allocation6 + %s358_s0]]  ;;  %s384_s12 = sadd.s32 4, %s1963_s30  ;;  %v454_v28 = vcvt.s32.f32 %v2006_v12  ;;  %v2032_v31 = vadd.s32 48, %v1969_v2  ;;  %v2035_v32 = vadd.s32 56, %v1969_v2  ;;  %v2044_v39 = vadd.s32 32, %v1969_v2 }
  0xf2   : > { %v330_v9 = vstv %s329_s2  ;;  %s1996_s6 = sld [smem:[#allocation6 + %s367_s4]]  ;;  %s393_s18 = sadd.s32 7, %s1963_s30  ;;  %v435_v56 = vadd.s32 40, %v1969_v2  ;;  %v455_v7 = vcvt.s32.f32 %v2023_v24  ;;  %v432_v8 = vadd.s32 16, %v1969_v2 }
  0xf3   : > { %s2551_s15 = sld [smem:[#allocation27_spill]]  ;;  %v334_v13 = vstv %s333_s9  ;;  %v331_v17 = vmul.f32 %v330_v9, %v327_v5  ;;  %s375_s0 = sadd.s32 9, %s1963_s30  ;;  %v452_v11 = vcvt.s32.f32 %v2032_v31 }
  0xf4   : > { %v335_v18 = vmul.f32 %v334_v13, %v327_v5  ;;  %v343_v19 = vstv %s342_s22  ;;  %s2013_s2 = sld [smem:[#allocation6 + %s380_s21]]  ;;  %s401_s4 = sadd.s32 10, %s1963_s30  ;;  %v453_v13 = vcvt.s32.f32 %v2035_v32  ;;  %v448_v31 = vcvt.s32.f32 %v432_v8 }
  0xf5   : > { %v344_v21 = vmul.f32 %v343_v19, %v1974_v3  ;;  %s2016_s5 = sld [smem:[#allocation6 + %s384_s12]]  ;;  %v351_v37 = vstv %s1978_s1  ;;  %v451_v19 = vcvt.s32.f32 %v435_v56  ;;  %v431_v32 = vadd.s32 8, %v1969_v2 }
  0xf6   : > { %v1148_v25 = vrot.slane %v335_v18, 9  ;;  %s2025_s9 = sld [smem:[#allocation6 + %s393_s18]]  ;;  %v356_v34 = vstv %s1984_s10  ;;  %v450_v18 = vcvt.s32.f32 %v2044_v39 }
  0xf7   : > { %v346_v29 = vrot.slane %v344_v21, 7  ;;  %v360_v30 = vstv %s1987_s25  ;;  %v357_v45 = vmul.f32 %v356_v34, %v327_v5  ;;  %s2056_s1 = sld [smem:[#allocation6 + %s375_s0]] }
  0xf8   : > { %v340_v33 = vadd.f32 %v1148_v25, %v331_v17  ;;  %v361_v35 = vmul.f32 %v360_v30, %v327_v5  ;;  %v369_v36 = vstv %s1996_s6  ;;  %s2060_s30 = sld [smem:[#allocation6 + %s401_s4]]  ;;  %v433_v30 = vadd.s32 24, %v1969_v2 }
  0xf9   : > { %s426_s8 = sadd.s32 %s2551_s15, %s1965_s24  ;;  %v370_v41 = vmul.f32 %v369_v36, %v1974_v3  ;;  %v446_v36 = vcvt.s32.f32 %v1969_v2 }
  0xfa   : > { %s1153_s22 = sshll.u32 %s426_s8, 7  ;;  %v348_v40 = vadd.f32 %v346_v29, %v340_v33  ;;  %v382_v42 = vstv %s2013_s2  ;;  %v1149_v46 = vrot.slane %v361_v35, 9 }
  0xfb   : > { %s428_s24 = scvt.s32.f32 %s1153_s22  ;;  %v386_v47 = vstv %s2016_s5  ;;  %v383_v50 = vmul.f32 %v382_v42, %v327_v5  ;;  %v372_v57 = vrot.slane %v370_v41, 7 }
  0xfc   : > { %v352_v49 = vadd.f32 %v351_v37, %v348_v40  ;;  %v387_v51 = vmul.f32 %v386_v47, %v327_v5  ;;  %v395_v52 = vstv %s2025_s9  ;;  %v366_v60 = vadd.f32 %v1149_v46, %v357_v45 }
  0xfd   : > { %v2041_v38 = vstv %s428_s24  ;;  %v396_v53 = vmul.f32 %v395_v52, %v1974_v3  ;;  %v377_v24 = vstv %s2056_s1  ;;  %v449_v47 = vcvt.s32.f32 %v433_v30 }
  0xfe   : > { %v2050_v43 = vadd.f32 %v2041_v38, %v460_v14  ;;  %v2054_v48 = vadd.f32 %v2041_v38, %v461_v20  ;;  %1340 = vrcp.f32 %v352_v49  ;;  %v1150_v58 = vrot.slane %v387_v51, 9 }
  0xff   : > { %v475_v59 = vadd.f32 %v2041_v38, %v458_v22  ;;  %v398_v61 = vrot.slane %v396_v53, 7  ;;  %v476_v63 = vadd.f32 %v2041_v38, %v459_v23  ;;  %v2068_v4 = vadd.f32 %v2041_v38, %v456_v26 }
 0x100   : > { %v493_v54 = vadd.f32 0.5, %v2050_v43  ;;  %v494_v55 = vadd.f32 0.5, %v2054_v48  ;;  %v392_v0 = vadd.f32 %v1150_v58, %v383_v50  ;;  %v2071_v6 = vadd.f32 %v2041_v38, %v457_v27 }
 0x101   : > { %v491_v3 = vadd.f32 0.5, %v475_v59  ;;  %v492_v5 = vadd.f32 0.5, %v476_v63  ;;  %v489_v10 = vadd.f32 0.5, %v2068_v4  ;;  %v374_v20 = vadd.f32 %v372_v57, %v366_v60 }
 0x102   : > { %v509_v62 = vmul.f32 0.03125, %v493_v54  ;;  %v510_v1 = vmul.f32 0.03125, %v494_v55  ;;  %v490_v17 = vadd.f32 0.5, %v2071_v6  ;;  %v400_v21 = vadd.f32 %v398_v61, %v392_v0 }
 0x103   : > { %v507_v9 = vmul.f32 0.03125, %v491_v3  ;;  %v508_v14 = vmul.f32 0.03125, %v492_v5  ;;  %v403_v25 = vstv %s2060_s30  ;;  %v505_v27 = vmul.f32 0.03125, %v489_v10 }
 0x104   : > { %v2080_v22 = vfloor.f32 %v509_v62  ;;  %v2082_v23 = vfloor.f32 %v510_v1  ;;  %v2091_v29 = vadd.f32 %v2041_v38, %v454_v28  ;;  %v506_v34 = vmul.f32 0.03125, %v490_v17 }
 0x105   : > { %v2086_v26 = vfloor.f32 %v507_v9  ;;  %v2095_v33 = vfloor.f32 %v508_v14  ;;  %v2098_v35 = vadd.f32 %v2041_v38, %v455_v7  ;;  %v378_v37 = vadd.f32 %v377_v24, %v374_v20 }
 0x106   : > { %v404_v39 = vadd.f32 %v403_v25, %v400_v21  ;;  %v541_v12 = vmul.f32 32.0, %v2080_v22  ;;  %v542_v28 = vmul.f32 32.0, %v2082_v23  ;;  %v2104_v41 = vfloor.f32 %v505_v27 }
 0x107   : > { %v539_v40 = vmul.f32 32.0, %v2086_v26  ;;  %v2107_v42 = vadd.f32 %v2041_v38, %v452_v11  ;;  %v2110_v44 = vadd.f32 %v2041_v38, %v453_v13  ;;  %v487_v45 = vadd.f32 0.5, %v2091_v29 }
 0x108   : > { %v2114_v46 = vadd.f32 %v2041_v38, %v450_v18  ;;  %v447_v49 = vcvt.s32.f32 %v431_v32  ;;  %v540_v51 = vmul.f32 32.0, %v2095_v33  ;;  %v2117_v52 = vfloor.f32 %v506_v34 }
 0x109   : > { %v488_v53 = vadd.f32 0.5, %v2098_v35  ;;  %v2121_v54 = vadd.f32 %v2041_v38, %v451_v19  ;;  %v2124_v57 = vsub.f32 %v2050_v43, %v541_v12  ;;  %v2127_v58 = vsub.f32 %v2054_v48, %v542_v28 }
 0x10a   : > { %v2129_v60 = vsub.f32 %v475_v59, %v539_v40  ;;  %v537_v61 = vmul.f32 32.0, %v2104_v41  ;;  %v485_v62 = vadd.f32 0.5, %v2107_v42  ;;  %v486_v0 = vadd.f32 0.5, %v2110_v44 }
 0x10b   : > { %v1341_v50 = vpop.eup %1340  ;;  %v483_v5 = vadd.f32 0.5, %v2114_v46  ;;  %v484_v7 = vadd.f32 0.5, %v2121_v54  ;;  %v2136_v8 = vsub.f32 %v476_v63, %v540_v51  ;;  %v538_v43 = vmul.f32 32.0, %v2117_v52 }
 0x10c   : > { %v379_v55 = vmul.f32 %v1341_v50, %v378_v37  ;;  %v405_v56 = vmul.f32 %v1341_v50, %v404_v39  ;;  %v503_v48 = vmul.f32 0.03125, %v487_v45  ;;  %v504_v9 = vmul.f32 0.03125, %v488_v53 }
 0x10d   : > { %v2140_v59 = vadd.f32 %v2041_v38, %v448_v31  ;;  %v2143_v10 = vadd.f32 %v2041_v38, %v449_v47  ;;  %v501_v14 = vmul.f32 0.03125, %v485_v62  ;;  %v502_v17 = vmul.f32 0.03125, %v486_v0 }
 0x10e   : > { %v406_v1 = vand.u32 2147483647, %v379_v55  ;;  %v409_v3 = vand.u32 2147483647, %v405_v56  ;;  %v499_v63 = vmul.f32 0.03125, %v483_v5  ;;  %v500_v20 = vmul.f32 0.03125, %v484_v7 }
 0x10f   : > { %v481_v21 = vadd.f32 0.5, %v2140_v59  ;;  %v482_v24 = vadd.f32 0.5, %v2143_v10  ;;  %v463_v25 = vadd.f32 %v2041_v38, %v446_v36  ;;  %v464_v27 = vadd.f32 %v2041_v38, %v447_v49 }
 0x110   : > { %vm407_vm0 = vcmp.gt.f32.partialorder %v406_v1, 10000.0  ;;  %vm410_vm1 = vcmp.gt.f32.partialorder %v409_v3, 10000.0  ;;  %v2149_v32 = vfloor.f32 %v503_v48  ;;  %v2151_v34 = vfloor.f32 %v504_v9 }
 0x111   : > { %v408_v11 = vsel %vm407_vm0, -1.0, %v379_v55  ;;  %v411_v13 = vsel %vm410_vm1, -1.0, %v405_v56  ;;  %v497_v37 = vmul.f32 0.03125, %v481_v21  ;;  %v498_v39 = vmul.f32 0.03125, %v482_v24 }
 0x112   : > { %v413_v18 = vmul.f32 0.032258064, %v408_v11  ;;  %v416_v19 = vmul.f32 0.032258064, %v411_v13  ;;  %v479_v12 = vadd.f32 0.5, %v463_v25  ;;  %v480_v28 = vadd.f32 0.5, %v464_v27 }
 0x113   : > { %v2153_v47 = vfloor.f32 %v501_v14  ;;  %v2155_v50 = vfloor.f32 %v502_v17  ;;  %v2157_v51 = vfloor.f32 %v499_v63  ;;  %v2159_v36 = vfloor.f32 %v500_v20 }
 0x114   : > { %v414_v30 = vmul.f32 2.0, %v413_v18  ;;  %v417_v31 = vmul.f32 2.0, %v416_v19  ;;  %v495_v38 = vmul.f32 0.03125, %v479_v12  ;;  %v496_v49 = vmul.f32 0.03125, %v480_v28 }
 0x115   : > { %v535_v56 = vmul.f32 32.0, %v2149_v32  ;;  %v536_v62 = vmul.f32 32.0, %v2151_v34  ;;  %v2163_v0 = vfloor.f32 %v497_v37  ;;  %v2165_v1 = vfloor.f32 %v498_v39 }
 0x116   : > { %v1151_v40 = vadd.f32 -1.0, %v414_v30  ;;  %v1152_v45 = vadd.f32 -1.0, %v417_v31  ;;  %v2167_v3 = vfloor.f32 %v495_v38  ;;  %v2169_v5 = vfloor.f32 %v496_v49 }
 0x117   : > { %v2172_v9 = vsub.f32 %v2068_v4, %v537_v61  ;;  %v2175_v11 = vsub.f32 %v2071_v6, %v538_v43  ;;  %v533_v13 = vmul.f32 32.0, %v2153_v47  ;;  %v534_v14 = vmul.f32 32.0, %v2155_v50 }
 0x118   : > { %v419_v53 = vadd.f32 1.0, %v1151_v40  ;;  %v422_v55 = vadd.f32 1.0, %v1152_v45  ;;  %v531_v17 = vmul.f32 32.0, %v2157_v51  ;;  %v532_v18 = vmul.f32 32.0, %v2159_v36 }
 0x119   : > { %v2182_v20 = vsub.f32 %v2091_v29, %v535_v56  ;;  %v2185_v21 = vsub.f32 %v2098_v35, %v536_v62  ;;  %v529_v4 = vmul.f32 32.0, %v2163_v0  ;;  %v530_v6 = vmul.f32 32.0, %v2165_v1 }
 0x11a   : > { %v420_v7 = vmul.f32 0.5, %v419_v53  ;;  %v423_v48 = vmul.f32 0.5, %v422_v55  ;;  %v527_v61 = vmul.f32 32.0, %v2167_v3  ;;  %v528_v43 = vmul.f32 32.0, %v2169_v5 }
 0x11b   : > { %v2198_v35 = vsub.f32 %v2107_v42, %v533_v13  ;;  %v2201_v37 = vsub.f32 %v2110_v44, %v534_v14  ;;  %v2204_v39 = vsub.f32 %v2114_v46, %v531_v17  ;;  %v2207_v12 = vsub.f32 %v2121_v54, %v532_v18 }
 0x11c   : > { %v421_v19 = vmul.f32 31.0, %v420_v7  ;;  %v424_v63 = vmul.f32 31.0, %v423_v48  ;;  %v2222_v44 = vsub.f32 %v2140_v59, %v529_v4  ;;  %v2225_v46 = vsub.f32 %v2143_v10, %v530_v6 }
 0x11d   : > { %v2227_v54 = vsub.f32 %v463_v25, %v527_v61  ;;  %v2229_v40 = vsub.f32 %v464_v27, %v528_v43 }
 0x11e   : > { %v567_v24 = vrot.slane %v421_v19, %v566_v16  ;;  %v714_v30 = vrot.slane %v424_v63, %v566_v16  ;;  %v563_v29 = vrot.slane %v421_v19, %v2010_v15  ;;  %v710_v31 = vrot.slane %v424_v63, %v2010_v15 }
 0x120   : > { %v2210_v28 = vrot.slane %v567_v24, %v2010_v15  ;;  %v2213_v2 = vrot.slane %v714_v30, %v2010_v15  ;;  %v2216_v16 = vrot.slane %v563_v29, %v2010_v15  ;;  %v2219_v42 = vrot.slane %v710_v31, %v2010_v15 }
 0x122   : > { %v607_v45 = vsub.f32 %v2210_v28, %v2124_v57  ;;  %v609_v38 = vsub.f32 %v2210_v28, %v2127_v58  ;;  %v754_v15 = vsub.f32 %v2213_v2, %v2080_v22  ;;  %v756_v59 = vsub.f32 %v2213_v2, %v2082_v23 }
 0x123   : > { %v606_v10 = vsub.f32 %v2216_v16, %v2124_v57  ;;  %v608_v25 = vsub.f32 %v2216_v16, %v2127_v58  ;;  %v753_v27 = vsub.f32 %v2219_v42, %v2080_v22  ;;  %v755_v49 = vsub.f32 %v2219_v42, %v2082_v23 }
 0x124   : > { %v639_v53 = vand.u32 2147483647, %v607_v45  ;;  %v641_v55 = vand.u32 2147483647, %v609_v38  ;;  %v786_v56 = vand.u32 2147483647, %v754_v15  ;;  %v603_v62 = vsub.f32 %v2210_v28, %v2129_v60 }
 0x125   : > { %v788_v7 = vand.u32 2147483647, %v756_v59  ;;  %v638_v48 = vand.u32 2147483647, %v606_v10  ;;  %v640_v13 = vand.u32 2147483647, %v608_v25  ;;  %v605_v57 = vsub.f32 %v2210_v28, %v2136_v8 }
 0x126   : > { %v671_v14 = vsub.f32 1.0, %v639_v53  ;;  %v673_v58 = vsub.f32 1.0, %v641_v55  ;;  %v818_v17 = vsub.f32 1.0, %v786_v56  ;;  %v785_v18 = vand.u32 2147483647, %v753_v27 }
 0x127   : > { %v820_v22 = vsub.f32 1.0, %v788_v7  ;;  %v670_v19 = vsub.f32 1.0, %v638_v48  ;;  %v672_v63 = vsub.f32 1.0, %v640_v13  ;;  %v787_v23 = vand.u32 2147483647, %v755_v49 }
 0x128   : > { %v703_v4 = vmax.f32 %v671_v14, 0.0  ;;  %v705_v6 = vmax.f32 %v673_v58, 0.0  ;;  %v850_v61 = vmax.f32 %v818_v17, 0.0  ;;  %v817_v43 = vsub.f32 1.0, %v785_v18 }
 0x129   : > { %v852_v24 = vmax.f32 %v820_v22, 0.0  ;;  %v702_v30 = vmax.f32 %v670_v19, 0.0  ;;  %v704_v29 = vmax.f32 %v672_v63, 0.0  ;;  %v819_v31 = vsub.f32 1.0, %v787_v23 }
 0x12a   : > { %v882_v45 = vmul.f32 %v850_v61, %v703_v4  ;;  %v849_v38 = vmax.f32 %v817_v43, 0.0  ;;  %v635_v15 = vand.u32 2147483647, %v603_v62  ;;  %v637_v59 = vand.u32 2147483647, %v605_v57 }
 0x12b   : > { %v884_v10 = vmul.f32 %v852_v24, %v705_v6  ;;  %v851_v25 = vmax.f32 %v819_v31, 0.0  ;;  %v750_v27 = vsub.f32 %v2213_v2, %v2086_v26  ;;  %v752_v49 = vsub.f32 %v2213_v2, %v2095_v33 }
 0x12c   : > { %v881_v53 = vmul.f32 %v849_v38, %v702_v30  ;;  %v667_v55 = vsub.f32 1.0, %v635_v15  ;;  %v669_v56 = vsub.f32 1.0, %v637_v59  ;;  %v602_v7 = vsub.f32 %v2216_v16, %v2129_v60 }
 0x12d   : > { %v906_v48 = vpack.c.bf16 %v884_v10, %v882_v45  ;;  %v883_v13 = vmul.f32 %v851_v25, %v704_v29  ;;  %v782_v14 = vand.u32 2147483647, %v750_v27  ;;  %v784_v58 = vand.u32 2147483647, %v752_v49 }
 0x12e   : > { %v699_v62 = vmax.f32 %v667_v55, 0.0  ;;  %v701_v57 = vmax.f32 %v669_v56, 0.0  ;;  %v604_v17 = vsub.f32 %v2216_v16, %v2136_v8  ;;  %v634_v18 = vand.u32 2147483647, %v602_v7 }
 0x12f   : > { %913 = vmatprep.subr.bf16.mxu0 %v906_v48  ;;  %v905_v22 = vpack.c.bf16 %v883_v13, %v881_v53  ;;  %v814_v19 = vsub.f32 1.0, %v782_v14  ;;  %v816_v63 = vsub.f32 1.0, %v784_v58  ;;  %v749_v23 = vsub.f32 %v2219_v42, %v2086_v26 }
 0x130   : > { %v636_v4 = vand.u32 2147483647, %v604_v17  ;;  %v666_v6 = vsub.f32 1.0, %v634_v18  ;;  %v751_v60 = vsub.f32 %v2219_v42, %v2095_v33  ;;  %v599_v61 = vsub.f32 %v2210_v28, %v2172_v9 }
 0x131   : > { %914 = vmatpush1.bf16.msra.mxu0 %v905_v22  ;;  %v846_v43 = vmax.f32 %v814_v19, 0.0  ;;  %v848_v24 = vmax.f32 %v816_v63, 0.0  ;;  %v781_v8 = vand.u32 2147483647, %v749_v23  ;;  %v601_v30 = vsub.f32 %v2210_v28, %v2175_v11 }
 0x132   : > { %v668_v29 = vsub.f32 1.0, %v636_v4  ;;  %v698_v31 = vmax.f32 %v666_v6, 0.0  ;;  %v783_v45 = vand.u32 2147483647, %v751_v60  ;;  %v631_v38 = vand.u32 2147483647, %v599_v61 }
 0x133   : > { %v878_v26 = vmul.f32 %v846_v43, %v699_v62  ;;  %v880_v15 = vmul.f32 %v848_v24, %v701_v57  ;;  %v813_v59 = vsub.f32 1.0, %v781_v8  ;;  %v633_v10 = vand.u32 2147483647, %v601_v30 }
 0x134   : > { %v700_v25 = vmax.f32 %v668_v29, 0.0  ;;  %v815_v33 = vsub.f32 1.0, %v783_v45  ;;  %v663_v27 = vsub.f32 1.0, %v631_v38  ;;  %v746_v49 = vsub.f32 %v2213_v2, %v2104_v41 }
 0x135   : > { %v904_v53 = vpack.c.bf16 %v880_v15, %v878_v26  ;;  %v845_v55 = vmax.f32 %v813_v59, 0.0  ;;  %v665_v56 = vsub.f32 1.0, %v633_v10  ;;  %v748_v7 = vsub.f32 %v2213_v2, %v2117_v52 }
 0x136   : > { %v847_v48 = vmax.f32 %v815_v33, 0.0  ;;  %v695_v13 = vmax.f32 %v663_v27, 0.0  ;;  %v778_v14 = vand.u32 2147483647, %v746_v49  ;;  %v598_v58 = vsub.f32 %v2216_v16, %v2172_v9 }
 0x137   : > { %915 = vmatprep.subr.bf16.mxu0 %v904_v53  ;;  %v877_v62 = vmul.f32 %v845_v55, %v698_v31  ;;  %v697_v57 = vmax.f32 %v665_v56, 0.0  ;;  %v780_v17 = vand.u32 2147483647, %v748_v7  ;;  %v600_v18 = vsub.f32 %v2216_v16, %v2175_v11 }
 0x138   : > { %v879_v22 = vmul.f32 %v847_v48, %v700_v25  ;;  %v810_v19 = vsub.f32 1.0, %v778_v14  ;;  %v630_v63 = vand.u32 2147483647, %v598_v58  ;;  %v745_v23 = vsub.f32 %v2219_v42, %v2104_v41 }
 0x139   : > { %v812_v4 = vsub.f32 1.0, %v780_v17  ;;  %v632_v6 = vand.u32 2147483647, %v600_v18  ;;  %v747_v60 = vsub.f32 %v2219_v42, %v2117_v52  ;;  %v595_v9 = vsub.f32 %v2210_v28, %v2182_v20 }
 0x13a   : > { %v903_v61 = vpack.c.bf16 %v879_v22, %v877_v62  ;;  %v842_v43 = vmax.f32 %v810_v19, 0.0  ;;  %v662_v24 = vsub.f32 1.0, %v630_v63  ;;  %v777_v8 = vand.u32 2147483647, %v745_v23 }
 0x13b   : > { %v844_v30 = vmax.f32 %v812_v4, 0.0  ;;  %v664_v11 = vsub.f32 1.0, %v632_v6  ;;  %v779_v29 = vand.u32 2147483647, %v747_v60  ;;  %v597_v31 = vsub.f32 %v2210_v28, %v2185_v21 }
 0x13c   : > { %916 = vmatpush1.bf16.msra.mxu0 %v903_v61  ;;  %v874_v41 = vmul.f32 %v842_v43, %v695_v13  ;;  %v694_v45 = vmax.f32 %v662_v24, 0.0  ;;  %v809_v38 = vsub.f32 1.0, %v777_v8  ;;  %v627_v26 = vand.u32 2147483647, %v595_v9 }
 0x13d   : > { %v876_v15 = vmul.f32 %v844_v30, %v697_v57  ;;  %v696_v52 = vmax.f32 %v664_v11, 0.0  ;;  %v811_v59 = vsub.f32 1.0, %v779_v29  ;;  %v629_v10 = vand.u32 2147483647, %v597_v31 }
 0x13e   : > { %v841_v25 = vmax.f32 %v809_v38, 0.0  ;;  %v659_v33 = vsub.f32 1.0, %v627_v26  ;;  %v742_v27 = vsub.f32 %v2213_v2, %v2149_v32  ;;  %v744_v49 = vsub.f32 %v2213_v2, %v2151_v34 }
 0x13f   : > { %v902_v53 = vpack.c.bf16 %v876_v15, %v874_v41  ;;  %v843_v55 = vmax.f32 %v811_v59, 0.0  ;;  %v661_v56 = vsub.f32 1.0, %v629_v10  ;;  %v594_v7 = vsub.f32 %v2216_v16, %v2182_v20 }
 0x140   : > { %v873_v48 = vmul.f32 %v841_v25, %v694_v45  ;;  %v691_v13 = vmax.f32 %v659_v33, 0.0  ;;  %v774_v14 = vand.u32 2147483647, %v742_v27  ;;  %v776_v58 = vand.u32 2147483647, %v744_v49 }
 0x141   : > { %917 = vmatprep.subr.bf16.mxu0 %v902_v53  ;;  %v875_v62 = vmul.f32 %v843_v55, %v696_v52  ;;  %v693_v57 = vmax.f32 %v661_v56, 0.0  ;;  %v596_v17 = vsub.f32 %v2216_v16, %v2185_v21  ;;  %v626_v18 = vand.u32 2147483647, %v594_v7 }
 0x142   : > { %v806_v22 = vsub.f32 1.0, %v774_v14  ;;  %v808_v19 = vsub.f32 1.0, %v776_v58  ;;  %v741_v63 = vsub.f32 %v2219_v42, %v2149_v32  ;;  %v743_v23 = vsub.f32 %v2219_v42, %v2151_v34 }
 0x143   : > { %v901_v20 = vpack.c.bf16 %v875_v62, %v873_v48  ;;  %v628_v4 = vand.u32 2147483647, %v596_v17  ;;  %v658_v6 = vsub.f32 1.0, %v626_v18  ;;  %v591_v60 = vsub.f32 %v2210_v28, %v2198_v35 }
 0x144   : > { %v838_v9 = vmax.f32 %v806_v22, 0.0  ;;  %v840_v61 = vmax.f32 %v808_v19, 0.0  ;;  %v773_v43 = vand.u32 2147483647, %v741_v63  ;;  %v775_v24 = vand.u32 2147483647, %v743_v23 }
 0x145   : > { %918 = vmatpush1.bf16.msra.mxu0 %v901_v20  ;;  %v660_v21 = vsub.f32 1.0, %v628_v4  ;;  %v690_v8 = vmax.f32 %v658_v6, 0.0  ;;  %v593_v30 = vsub.f32 %v2210_v28, %v2201_v37  ;;  %v623_v32 = vand.u32 2147483647, %v591_v60 }
 0x146   : > { %v870_v11 = vmul.f32 %v838_v9, %v691_v13  ;;  %v872_v29 = vmul.f32 %v840_v61, %v693_v57  ;;  %v805_v34 = vsub.f32 1.0, %v773_v43  ;;  %v807_v31 = vsub.f32 1.0, %v775_v24 }
 0x147   : > { %v692_v41 = vmax.f32 %v660_v21, 0.0  ;;  %v625_v45 = vand.u32 2147483647, %v593_v30  ;;  %v655_v38 = vsub.f32 1.0, %v623_v32  ;;  %v738_v26 = vsub.f32 %v2213_v2, %v2153_v47 }
 0x148   : > { %v900_v15 = vpack.c.bf16 %v872_v29, %v870_v11  ;;  %v837_v52 = vmax.f32 %v805_v34, 0.0  ;;  %v839_v59 = vmax.f32 %v807_v31, 0.0  ;;  %v740_v10 = vsub.f32 %v2213_v2, %v2155_v50 }
 0x149   : > { %v657_v25 = vsub.f32 1.0, %v625_v45  ;;  %v687_v33 = vmax.f32 %v655_v38, 0.0  ;;  %v770_v27 = vand.u32 2147483647, %v738_v26  ;;  %v590_v49 = vsub.f32 %v2216_v16, %v2198_v35 }
 0x14a   : > { %919 = vmatprep.subr.bf16.mxu0 %v900_v15  ;;  %v869_v53 = vmul.f32 %v837_v52, %v690_v8  ;;  %v871_v55 = vmul.f32 %v839_v59, %v692_v41  ;;  %v772_v56 = vand.u32 2147483647, %v740_v10  ;;  %v592_v7 = vsub.f32 %v2216_v16, %v2201_v37 }
 0x14b   : > { %v689_v48 = vmax.f32 %v657_v25, 0.0  ;;  %v802_v13 = vsub.f32 1.0, %v770_v27  ;;  %v622_v14 = vand.u32 2147483647, %v590_v49  ;;  %v737_v58 = vsub.f32 %v2219_v42, %v2153_v47 }
 0x14c   : > { %v899_v62 = vpack.c.bf16 %v871_v55, %v869_v53  ;;  %v804_v57 = vsub.f32 1.0, %v772_v56  ;;  %v624_v17 = vand.u32 2147483647, %v592_v7  ;;  %v739_v18 = vsub.f32 %v2219_v42, %v2155_v50 }
 0x14d   : > { %v834_v35 = vmax.f32 %v802_v13, 0.0  ;;  %v654_v22 = vsub.f32 1.0, %v622_v14  ;;  %v769_v19 = vand.u32 2147483647, %v737_v58  ;;  %v587_v63 = vsub.f32 %v2210_v28, %v2204_v39 }
 0x14e   : > { %920 = vmatpush1.bf16.msra.mxu0 %v899_v62  ;;  %v836_v37 = vmax.f32 %v804_v57, 0.0  ;;  %v656_v23 = vsub.f32 1.0, %v624_v17  ;;  %v771_v20 = vand.u32 2147483647, %v739_v18  ;;  %v589_v4 = vsub.f32 %v2210_v28, %v2207_v12 }
 0x14f   : > { %v866_v47 = vmul.f32 %v834_v35, %v687_v33  ;;  %v686_v6 = vmax.f32 %v654_v22, 0.0  ;;  %v801_v60 = vsub.f32 1.0, %v769_v19  ;;  %v619_v9 = vand.u32 2147483647, %v587_v63 }
 0x150   : > { %v868_v61 = vmul.f32 %v836_v37, %v689_v48  ;;  %v688_v43 = vmax.f32 %v656_v23, 0.0  ;;  %v803_v50 = vsub.f32 1.0, %v771_v20  ;;  %v621_v24 = vand.u32 2147483647, %v589_v4 }
 0x151   : > { %v833_v21 = vmax.f32 %v801_v60, 0.0  ;;  %v651_v8 = vsub.f32 1.0, %v619_v9  ;;  %v734_v30 = vsub.f32 %v2213_v2, %v2157_v51  ;;  %v736_v32 = vsub.f32 %v2213_v2, %v2159_v36 }
 0x152   : > { %v898_v11 = vpack.c.bf16 %v868_v61, %v866_v47  ;;  %v835_v29 = vmax.f32 %v803_v50, 0.0  ;;  %v653_v34 = vsub.f32 1.0, %v621_v24  ;;  %v586_v31 = vsub.f32 %v2216_v16, %v2204_v39 }
 0x153   : > { %v865_v41 = vmul.f32 %v833_v21, %v686_v6  ;;  %v683_v45 = vmax.f32 %v651_v8, 0.0  ;;  %v766_v38 = vand.u32 2147483647, %v734_v30  ;;  %v768_v26 = vand.u32 2147483647, %v736_v32 }
 0x154   : > { %921 = vmatprep.subr.bf16.mxu0 %v898_v11  ;;  %v867_v15 = vmul.f32 %v835_v29, %v688_v43  ;;  %v685_v52 = vmax.f32 %v653_v34, 0.0  ;;  %v588_v59 = vsub.f32 %v2216_v16, %v2207_v12  ;;  %v618_v10 = vand.u32 2147483647, %v586_v31 }
 0x155   : > { %v798_v25 = vsub.f32 1.0, %v766_v38  ;;  %v800_v33 = vsub.f32 1.0, %v768_v26  ;;  %v733_v27 = vsub.f32 %v2219_v42, %v2157_v51  ;;  %v735_v49 = vsub.f32 %v2219_v42, %v2159_v36 }
 0x156   : > { %v897_v39 = vpack.c.bf16 %v867_v15, %v865_v41  ;;  %v620_v53 = vand.u32 2147483647, %v588_v59  ;;  %v650_v55 = vsub.f32 1.0, %v618_v10  ;;  %v583_v56 = vsub.f32 %v2210_v28, %v2222_v44 }
 0x157   : > { %v830_v7 = vmax.f32 %v798_v25, 0.0  ;;  %v832_v48 = vmax.f32 %v800_v33, 0.0  ;;  %v765_v13 = vand.u32 2147483647, %v733_v27  ;;  %v767_v14 = vand.u32 2147483647, %v735_v49 }
 0x158   : > { %922 = vmatpush1.bf16.msra.mxu0 %v897_v39  ;;  %v652_v12 = vsub.f32 1.0, %v620_v53  ;;  %v682_v58 = vmax.f32 %v650_v55, 0.0  ;;  %v585_v62 = vsub.f32 %v2210_v28, %v2225_v46  ;;  %v615_v51 = vand.u32 2147483647, %v583_v56 }
 0x159   : > { %v862_v57 = vmul.f32 %v830_v7, %v683_v45  ;;  %v864_v17 = vmul.f32 %v832_v48, %v685_v52  ;;  %v797_v36 = vsub.f32 1.0, %v765_v13  ;;  %v799_v18 = vsub.f32 1.0, %v767_v14 }
 0x15a   : > { %v684_v35 = vmax.f32 %v652_v12, 0.0  ;;  %v617_v22 = vand.u32 2147483647, %v585_v62  ;;  %v647_v19 = vsub.f32 1.0, %v615_v51  ;;  %v730_v63 = vsub.f32 %v2213_v2, %v2163_v0 }
 0x15b   : > { %v896_v37 = vpack.c.bf16 %v864_v17, %v862_v57  ;;  %v829_v23 = vmax.f32 %v797_v36, 0.0  ;;  %v831_v20 = vmax.f32 %v799_v18, 0.0  ;;  %v732_v4 = vsub.f32 %v2213_v2, %v2165_v1 }
 0x15c   : > { %v649_v47 = vsub.f32 1.0, %v617_v22  ;;  %v679_v6 = vmax.f32 %v647_v19, 0.0  ;;  %v762_v60 = vand.u32 2147483647, %v730_v63  ;;  %v582_v9 = vsub.f32 %v2216_v16, %v2222_v44 }
 0x15d   : > { %923 = vmatprep.subr.bf16.mxu0 %v896_v37  ;;  %v861_v61 = vmul.f32 %v829_v23, %v682_v58  ;;  %v863_v43 = vmul.f32 %v831_v20, %v684_v35  ;;  %v764_v50 = vand.u32 2147483647, %v732_v4  ;;  %v584_v24 = vsub.f32 %v2216_v16, %v2225_v46 }
 0x15e   : > { %v681_v21 = vmax.f32 %v649_v47, 0.0  ;;  %v794_v8 = vsub.f32 1.0, %v762_v60  ;;  %v614_v30 = vand.u32 2147483647, %v582_v9  ;;  %v729_v32 = vsub.f32 %v2219_v42, %v2163_v0 }
 0x15f   : > { %v895_v11 = vpack.c.bf16 %v863_v43, %v861_v61  ;;  %v796_v29 = vsub.f32 1.0, %v764_v50  ;;  %v616_v34 = vand.u32 2147483647, %v584_v24  ;;  %v731_v31 = vsub.f32 %v2219_v42, %v2165_v1 }
 0x160   : > { %v826_v44 = vmax.f32 %v794_v8, 0.0  ;;  %v646_v41 = vsub.f32 1.0, %v614_v30  ;;  %v761_v45 = vand.u32 2147483647, %v729_v32  ;;  %v579_v38 = vsub.f32 %v2210_v28, %v2227_v54  ;;  %v885_v8 = vld [vmem:[#allocation2 + $0x10] sm:$0xff]  ;;  %v886_v32 = vld [vmem:[#allocation2] sm:$0xff] }
 0x161   : > { %924 = vmatpush1.bf16.msra.mxu0 %v895_v11  ;;  %v828_v46 = vmax.f32 %v796_v29, 0.0  ;;  %v648_v26 = vsub.f32 1.0, %v616_v34  ;;  %v763_v15 = vand.u32 2147483647, %v731_v31  ;;  %v581_v52 = vsub.f32 %v2210_v28, %v2229_v40  ;;  %v887_v34 = vld [vmem:[#allocation2 + $0x18] sm:$0xff] }
 0x162   : > { %v858_v0 = vmul.f32 %v826_v44, %v679_v6  ;;  %v678_v59 = vmax.f32 %v646_v41, 0.0  ;;  %v793_v10 = vsub.f32 1.0, %v761_v45  ;;  %v611_v25 = vand.u32 2147483647, %v579_v38  ;;  %v888_v41 = vld [vmem:[#allocation2 + $0x8] sm:$0xff] }
 0x163   : > { %v860_v33 = vmul.f32 %v828_v46, %v681_v21  ;;  %v680_v27 = vmax.f32 %v648_v26, 0.0  ;;  %v795_v1 = vsub.f32 1.0, %v763_v15  ;;  %v613_v49 = vand.u32 2147483647, %v581_v52  ;;  %v1339_v21 = vld [vmem:[%s270_s27] sm:$0xff]  }
 0x164   : > { %v825_v39 = vmax.f32 %v793_v10, 0.0  ;;  %v643_v53 = vsub.f32 1.0, %v611_v25  ;;  %v726_v55 = vsub.f32 %v2213_v2, %v2167_v3  ;;  %v728_v56 = vsub.f32 %v2213_v2, %v2169_v5 }
 0x165   : > { %v894_v7 = vpack.c.bf16 %v860_v33, %v858_v0  ;;  %v827_v48 = vmax.f32 %v795_v1, 0.0  ;;  %v645_v13 = vsub.f32 1.0, %v613_v49  ;;  %v578_v28 = vsub.f32 %v2216_v16, %v2227_v54 }
 0x166   : > { %v857_v14 = vmul.f32 %v825_v39, %v678_v59  ;;  %v675_v12 = vmax.f32 %v643_v53, 0.0  ;;  %v758_v58 = vand.u32 2147483647, %v726_v55  ;;  %v760_v62 = vand.u32 2147483647, %v728_v56 }
 0x167   : > { %925 = vmatprep.subr.bf16.mxu0 %v894_v7  ;;  %v859_v51 = vmul.f32 %v827_v48, %v680_v27  ;;  %v677_v57 = vmax.f32 %v645_v13, 0.0  ;;  %v580_v17 = vsub.f32 %v2216_v16, %v2229_v40  ;;  %v610_v36 = vand.u32 2147483647, %v578_v28 }
 0x168   : > { %v790_v18 = vsub.f32 1.0, %v758_v58  ;;  %v792_v35 = vsub.f32 1.0, %v760_v62  ;;  %v725_v2 = vsub.f32 %v2219_v42, %v2167_v3  ;;  %v727_v22 = vsub.f32 %v2219_v42, %v2169_v5 }
 0x169   : > { %v893_v54 = vpack.c.bf16 %v859_v51, %v857_v14  ;;  %v612_v19 = vand.u32 2147483647, %v580_v17  ;;  %v642_v63 = vsub.f32 1.0, %v610_v36 }
 0x16a   : > { %v822_v37 = vmax.f32 %v790_v18, 0.0  ;;  %v824_v23 = vmax.f32 %v792_v35, 0.0  ;;  %v757_v20 = vand.u32 2147483647, %v725_v2  ;;  %v759_v4 = vand.u32 2147483647, %v727_v22 }
 0x16b   : > { %926 = vmatpush1.bf16.msra.mxu0 %v893_v54  ;;  %v644_v47 = vsub.f32 1.0, %v612_v19  ;;  %v674_v16 = vmax.f32 %v642_v63, 0.0 }
 0x16c   : > { %v854_v40 = vmul.f32 %v822_v37, %v675_v12  ;;  %v856_v6 = vmul.f32 %v824_v23, %v677_v57  ;;  %v789_v60 = vsub.f32 1.0, %v757_v20  ;;  %v791_v9 = vsub.f32 1.0, %v759_v4 }
 0x16d   : > { %v676_v61 = vmax.f32 %v644_v47, 0.0 }
 0x16e   : > { %v892_v3 = vpack.c.bf16 %v856_v6, %v854_v40  ;;  %v821_v43 = vmax.f32 %v789_v60, 0.0  ;;  %v823_v50 = vmax.f32 %v791_v9, 0.0 }
 0x170   : > { %927 = vmatprep.subr.bf16.mxu0 %v892_v3  ;;  %v853_v5 = vmul.f32 %v821_v43, %v674_v16  ;;  %v855_v42 = vmul.f32 %v823_v50, %v676_v61 }
 0x172   : > { %v891_v24 = vpack.c.bf16 %v855_v42, %v853_v5 }
 0x174   : > { %928 = vmatpush1.bf16.msra.mxu0 %v891_v24 }
 0x177   : > { %946 = vmatmul.mubr.bf16.vlgmr.msra.gmra.mxu0 %v1339_v21 }
 0x237   : > { %v947_v30 = vpop.f32.mrf.mxu0 }
 0x238   : > { %v956_v11 = vadd.f32 %v947_v30, %v885_v8 }
 0x239   : > { %v949_v29 = vpop.f32.mrf.mxu0 }
 0x23a   : > { %960 = vst [vmem:[#allocation2 + $0x10] sm:$0xff] %v956_v11  ;;  %v957_v31 = vadd.f32 %v949_v29, %v886_v32 }
 0x23b   : > { %v951_v44 = vpop.f32.mrf.mxu0 }
 0x23c   : > { %961 = vst [vmem:[#allocation2] sm:$0xff] %v957_v31  ;;  %v958_v45 = vadd.f32 %v951_v44, %v887_v34 }
 0x23d   : > { %v953_v38 = vpop.f32.mrf.mxu0 }
 0x23e   : > { %962 = vst [vmem:[#allocation2 + $0x18] sm:$0xff] %v958_v45  ;;  %v959_v46 = vadd.f32 %v953_v38, %v888_v41 }
 0x240   : > { %963 = vst [vmem:[#allocation2 + $0x8] sm:$0xff] %v959_v46 }
 0x241 PF: > { %s2552_s13 = sld [smem:[#allocation27_spill]] }
 0x247   : > { %p1155_p9 = scmp.ne.s32.totalorder %s2552_s13, 7 }
 0x249   : > { %967 = sbr.rel (%p1155_p9) target bundleno = 593 (0x251), region = 56 }
 0x24e   : > { %v968_v26 = vld [vmem:[#allocation2 + $0x10] sm:$0xff]  ;;  %v969_v15 = vld [vmem:[#allocation2] sm:$0xff]  ;;  %v970_v52 = vld [vmem:[#allocation2 + $0x18] sm:$0xff] }
 0x24f   : > { %972 = vst [vmem:[%s1956_s23] sm:$0xff] %v968_v26  ;;  %973 = vst [vmem:[%s1956_s23 + $0x8] sm:$0xff] %v969_v15  ;;  %v971_v0 = vld [vmem:[#allocation2 + $0x8] sm:$0xff] }
 0x250   : > { %974 = vst [vmem:[%s1956_s23 + $0x10] sm:$0xff] %v970_v52  ;;  %975 = vst [vmem:[%s1956_s23 + $0x18] sm:$0xff] %v971_v0 }
 0x251 PF: > { %s2553_s27 = sld [smem:[#allocation28_spill]]  ;;  %s992_s15 = sshll.u32 %s1956_s23, 4  ;;  %s2369_s15 = int_to_ptr.vmem [resolvable:$true] %s992_s15 }
 0x252   : > { %s2554_s10 = sld [smem:[#allocation29_spill]]  ;;  %s2378_s0 = scalar_lea.sflag [#allocation8], %s296_s7 }
 0x253   : > { %s2556_s21 = sld [smem:[#allocation34_spill]]  ;;  %s1433_s4 = scalar_lea.vmem %s2369_s15, 512 }
 0x254   : > { %s2557_s9 = sld [smem:[#allocation43_spill]]  ;;  %p1434_p11 = scmp.ne.s32.totalorder %s2369_s15, %s1433_s4 }
 0x255   : > { %s1615_s23 = smov [#allocation13]  }
 0x256   : > { %s1437_s1 = sshll.u32 %s1615_s23, 4  ;;  %s1438_s1 = int_to_ptr.vmem [resolvable:$false] %s1437_s1 }
 0x257   : > { %s1157_s6 = sshll.u32 %s2553_s27, 1  ;;  %s1439_s30 = scalar_lea.vmem %s1438_s1, 1024 }
 0x258   : > { %s1158_s12 = sshll.u32 %s2554_s10, 3  ;;  %p1440_p10 = scmp.lt.s32.totalorder %s2369_s15, %s1438_s1 }
 0x259   : > { %s989_s18 = sadd.s32 %s1158_s12, %s1157_s6  ;;  %p2559_p7 = scmp.ne.s32.totalorder %s2556_s21, 0 }
 0x25a   : > { %s1159_s2 = sshll.u32 %s989_s18, 7  ;;  %s2558_s22 = smov %s2557_s9 }
 0x25b   : > { %s2374_s24 = scalar_lea.hbm %s2557_s9, %s1159_s2  ;;  %p1435_p12 = pnand %p1434_p11, %p2559_p7 }
 0x25c   : > { %p1441_p0 = scmp.lt.s32.totalorder %s1439_s30, %s1433_s4 }
 0x25d   : > { %p1436_p4 = pneg %p1435_p12 }
 0x25e   : > { %p1442_p8 = por %p1441_p0, %p1440_p10 }
 0x260   : > { %p1443_p13 = pnand %p1442_p8, %p1436_p4 }
 0x262   : > { %1446 = shalt.err (!%p1443_p13)
}
 0x263   : > { %s1447_s7 = scalar_lea.hbm %s2374_s24, 512  ;;  %s1451_s10 = scalar_lea.hbm %s2558_s22, 2048 }
 0x264   : > { %p1448_p1 = scmp.ne.s32.totalorder %s2374_s24, %s1447_s7  ;;  %p1452_p3 = scmp.lt.s32.totalorder %s2374_s24, %s2558_s22 }
 0x265   : > { %p1453_p6 = scmp.lt.s32.totalorder %s1451_s10, %s1447_s7 }
 0x266   : > { %p1449_p5 = pnand %p1448_p1, %p2559_p7 }
 0x267   : > { %p1454_p9 = por %p1453_p6, %p1452_p3 }
 0x268   : > { %p1450_p2 = pneg %p1449_p5 }
 0x26a   : > { %p1455_p11 = pnand %p1454_p9, %p1450_p2 }
 0x26c   : > { %1458 = shalt.err (!%p1455_p11)
}
 0x26d   : > { %s1616_s12 = smov 256   ;;  %s1617_s18 = smov 512  }
 0x26e   : > { %s1618_s2 = smov 16  }
 0x26f   : > { %1175 = dma.vmem_to_hbm [thread:$0]  (%p2559_p7), %s2369_s15, 512, %s2374_s24, %s2378_s0, %s1616_s12, %s1617_s18, %s1618_s2  }
 0x270 PF: > { %s2560_s5 = sld [smem:[#allocation23_spill]]  ;;  %p1199_p12 = scmp.ge.s32.totalorder %s1603_s14, 2 }
 0x271   : > { %s2561_s8 = sld [smem:[#allocation35_spill]] }
 0x276   : > { %s1007_s9 = sand.u32 1, %s2560_s5  }
 0x277   : > { %p2562_p4 = scmp.ne.s32.totalorder %s2561_s8, 0  ;;  %s1008_s4 = scalar_lea.sflag [#allocation8], %s1007_s9 }
 0x279   : > { %p1193_p10 = pnand %p1199_p12, %p2562_p4 }
 0x27b   : > { %p1194_p0 = pneg %p1193_p10 }
 0x27d   : > { %1538 = dma.done.wait (%p1194_p0), %s1008_s4, 512  }
 0x27e   : > { %1540 = vsyncadd (%p1194_p0), %s1008_s4, 4294966784  ;;  %s33_s14 = sadd.s32 1, %s1603_s14   ;;  %s2564_s0 = sld [smem:[#allocation24_spill]] }
 0x27f   : > { %p2406_p8 = scmp.ge.s32.totalorder %s33_s14, 34   ;;  %s2565_s30 = sld [smem:[#allocation25_spill]] }
 0x280   : > { %s2566_s6 = sld [smem:[#allocation26_spill]]  ;;  %s2572_s1 = smov %s1551_s26 }
 0x281   : > { %s2567_s7 = sld [smem:[#allocation40_spill]]  ;;  %s2573_s26 = smov %s1843_s19 }
 0x282   : > { %s2568_s9 = sld [smem:[#allocation30_spill]]  ;;  %s2574_s27 = smov %s1559_s28 }
 0x283   : > { %s2569_s10 = sld [smem:[#allocation31_spill]]  ;;  %s2575_s28 = smov %s1563_s29 }
 0x284   : > { %s2570_s12 = sld [smem:[#allocation37_spill]]  ;;  %s2576_s29 = smov %s1876_s20 }
 0x285   : > { %s2571_s13 = sld [smem:[#allocation39_spill]]  ;;  %s2577_s8 = smov %s1591_s11 }
 0x286   : > { %s2578_s11 = smov %s2580_s16  ;;  %32 = sbr.rel (!%p2406_p8) target bundleno = 31 (0x1f), region = 107 }
 0x28b   :  { %1013 = vsyncpa [#allocation7], 1 }
 0x28c   :  { %1015 = vsyncpa [#allocation7 + $0x1], 1 }
 0x28d   :  { %1016 = vsyncpa [#allocation12], 1 }
 0x28e   :  { %1018 = vsyncpa [#allocation12 + $0x1], 1 }
 0x28f   :  { %1019 = vsyncpa [#allocation8], 1 }
 0x290   :  { %1021 = vsyncpa [#allocation8 + $0x1], 1 }
 0x291   :  { %1022 = vsyncpa [#allocation9], 1 }
 0x292   :  { %1024 = vsyncpa [#allocation9 + $0x1], 1 }

</bundles_post_ra>
